<compile_context>
chip_gen: v7x
topology: tpu7x:2x2x1
jax: 0.10.0
libtpu: 0.0.40
codegen_flags: <defaults>
</compile_context>

<pallas_src>
import functools

import jax
import jax.numpy as jnp
from jax import lax
from jax.experimental import pallas as pl
from jax.experimental.pallas import tpu as pltpu


LEAKY_SLOPE = 0.2
BN_EPS = 1e-5
DEFAULT_BLOCK_L = 1024                 # lane-dense L tile (multiple of 128)
ACT_DTYPE = jnp.bfloat16               # HBM dtype for activations/weights (f32 accumulate)


def _round_up(x, m):
    return ((x + m - 1) // m) * m


def _vmem_limit_bytes():
    # Generation-aware: ~half of physical VMEM (32 MiB on v7x, 64 MiB on v5e/v6e).
    try:
        cap = int(pltpu.get_tpu_info().vmem_capacity_bytes)
        return min(64 * 1024 * 1024, max(16 * 1024 * 1024, cap // 2))
    except Exception:
        return 32 * 1024 * 1024


_VMEM_LIMIT = _vmem_limit_bytes()


def _compiler_params():
    return pltpu.CompilerParams(
        dimension_semantics=("parallel", "parallel"),
        vmem_limit_bytes=_VMEM_LIMIT,
    )


# -----------------------------------------------------------------------------
# Stride-1 Conv1d kernel with fused input affine+LeakyReLU, padding mask,
# bias / output LeakyReLU, and optional BatchNorm partial statistics.
# -----------------------------------------------------------------------------
def _conv_s1_kernel(x_ref, lh_ref, rh_ref, w_ref, b_ref, s_ref, h_ref, o_ref, *stat_refs,
                    num_taps, pad, l_in, l_out, apply_in_affine, out_leaky,
                    emit_stats, leaky_slope):
    """One (batch, L-tile) grid step.

    x_ref : (C_in, TL)        main input tile (raw previous-layer output)
    lh_ref: (C_in, pad)       left halo  (last `pad` cols of tile j-1; zeros for j=0)
    rh_ref: (C_in, K-1-pad)   right halo (first cols of tile j+1; zeros for last tile)
    w_ref : (C_out, K*C_in)   taps folded into the contraction dim
    b_ref : (C_out, 1) f32    bias (zeros when the conv has none)
    s_ref : (C_in, 1)  f32    fused input BN scale  (unused unless apply_in_affine)
    h_ref : (C_in, 1)  f32    fused input BN shift  (unused unless apply_in_affine)
    o_ref : (C_out, TL)
    stat_refs (optional): sum_ref, sq_ref each (C_out, 1) f32 per-tile partial stats.
    """
    tl = o_ref.shape[-1]
    j = pl.program_id(1)

    # Assemble the tile window (C_in, TL + K - 1); column t holds input col j*TL - pad + t.
    win = jnp.concatenate([lh_ref[...], x_ref[...], rh_ref[...]], axis=1)
    wlen = win.shape[1]
    col = j * tl - pad + lax.broadcasted_iota(jnp.int32, (1, wlen), 1)
    valid = (col >= 0) & (col < l_in)            # conv zero-padding + garbage-column mask

    if apply_in_affine:                          # previous layer's BN affine + LeakyReLU
        wf = win.astype(jnp.float32) * s_ref[...] + h_ref[...]
        wf = jnp.where(wf >= 0, wf, leaky_slope * wf)
        win = wf.astype(win.dtype)
    win = jnp.where(valid, win, jnp.zeros_like(win))

    # Fold the K taps into a single contraction: slab row k*C_in + c = tap k, channel c.
    slab = jnp.concatenate([win[:, k:k + tl] for k in range(num_taps)], axis=0)
    acc = jnp.dot(w_ref[...], slab, preferred_element_type=jnp.float32)   # (C_out, TL) f32
    acc = acc + b_ref[...]
    if out_leaky:
        acc = jnp.where(acc >= 0, acc, leaky_slope * acc)
    o_ref[...] = acc.astype(o_ref.dtype)

    if emit_stats:
        sum_ref, sq_ref = stat_refs
        oc = j * tl + lax.broadcasted_iota(jnp.int32, (1, tl), 1)
        m = (oc < l_out).astype(jnp.float32)     # mask tile columns beyond the true length
        am = acc * m
        sum_ref[...] = jnp.sum(am, axis=1, keepdims=True)
        sq_ref[...] = jnp.sum(am * am, axis=1, keepdims=True)


def conv1d_s1_pallas(x, l_in, weight, bias=None, *, padding, in_scale=None, in_shift=None,
                     out_leaky=False, emit_stats=False, leaky_slope=LEAKY_SLOPE,
                     block_l=DEFAULT_BLOCK_L, act_dtype=ACT_DTYPE, out_dtype=None):
    """Stride-1 PyTorch Conv1d on a physically tile-rounded activation.

    x      : (N, C_in, Lphys) where the first l_in columns are valid data.
    Returns: (y_physical (N, C_out, T*TL), l_out[, sums, sqs]).
    """
    assert block_l % 128 == 0
    n, c_in, l_phys = x.shape
    c_out, _, ksz = weight.shape
    l_out = l_in + 2 * padding - ksz + 1
    assert l_out > 0
    lh_w, rh_w = padding, ksz - 1 - padding
    assert lh_w > 0 and rh_w > 0                    # holds for every conv in this model

    tl = min(block_l, _round_up(l_out, 128))
    t = pl.cdiv(l_out, tl)
    lp = t * tl

    xp = x.astype(act_dtype)
    if l_phys < lp:
        xp = jnp.pad(xp, ((0, 0), (0, 0), (0, lp - l_phys)))
    elif l_phys > lp:
        xp = xp[:, :, :lp]

    # Tiny per-tile halo arrays (only K-1 columns per tile leave/enter a neighbor tile).
    xr = xp.reshape(n, c_in, t, tl)
    if t > 1:
        lh = jnp.concatenate(
            [jnp.zeros((n, c_in, 1, lh_w), act_dtype), xr[:, :, :t - 1, tl - lh_w:]], axis=2)
        rh = jnp.concatenate(
            [xr[:, :, 1:, :rh_w], jnp.zeros((n, c_in, 1, rh_w), act_dtype)], axis=2)
    else:
        lh = jnp.zeros((n, c_in, 1, lh_w), act_dtype)
        rh = jnp.zeros((n, c_in, 1, rh_w), act_dtype)
    lh = jnp.transpose(lh, (0, 2, 1, 3))            # (N, T, C_in, lh_w)
    rh = jnp.transpose(rh, (0, 2, 1, 3))            # (N, T, C_in, rh_w)

    # weight (C_out, C_in, K) -> (C_out, K*C_in) matching slab row order k*C_in + c.
    w_flat = jnp.transpose(weight, (0, 2, 1)).reshape(c_out, ksz * c_in).astype(act_dtype)
    b_col = (jnp.zeros((c_out,), jnp.float32) if bias is None
             else bias.astype(jnp.float32)).reshape(c_out, 1)
    have_aff = in_scale is not None
    s_col = (in_scale if have_aff else jnp.ones((c_in,), jnp.float32)
             ).astype(jnp.float32).reshape(c_in, 1)
    h_col = (in_shift if have_aff else jnp.zeros((c_in,), jnp.float32)
             ).astype(jnp.float32).reshape(c_in, 1)

    odt = act_dtype if out_dtype is None else out_dtype
    out_shapes = [jax.ShapeDtypeStruct((n, c_out, lp), odt)]
    out_specs = [pl.BlockSpec((pl.Squeezed(), c_out, tl), lambda b, j: (b, 0, j))]
    if emit_stats:
        stat_spec = pl.BlockSpec((pl.Squeezed(), pl.Squeezed(), c_out, 1),
                                 lambda b, j: (b, j, 0, 0))
        out_shapes += [jax.ShapeDtypeStruct((n, t, c_out, 1), jnp.float32)] * 2
        out_specs += [stat_spec, stat_spec]

    kernel = functools.partial(
        _conv_s1_kernel, num_taps=ksz, pad=padding, l_in=l_in, l_out=l_out,
        apply_in_affine=have_aff, out_leaky=out_leaky, emit_stats=emit_stats,
        leaky_slope=leaky_slope)

    res = pl.pallas_call(
        kernel,
        out_shape=tuple(out_shapes),
        grid_spec=pltpu.PrefetchScalarGridSpec(
            num_scalar_prefetch=0,
            grid=(n, t),
            in_specs=[
                pl.BlockSpec((pl.Squeezed(), c_in, tl), lambda b, j: (b, 0, j)),
                pl.BlockSpec((pl.Squeezed(), pl.Squeezed(), c_in, lh_w),
                             lambda b, j: (b, j, 0, 0)),
                pl.BlockSpec((pl.Squeezed(), pl.Squeezed(), c_in, rh_w),
                             lambda b, j: (b, j, 0, 0)),
                pl.BlockSpec((c_out, ksz * c_in), lambda b, j: (0, 0)),   # fetched once
                pl.BlockSpec((c_out, 1), lambda b, j: (0, 0)),            # fetched once
                pl.BlockSpec((c_in, 1), lambda b, j: (0, 0)),             # fetched once
                pl.BlockSpec((c_in, 1), lambda b, j: (0, 0)),             # fetched once
            ],
            out_specs=tuple(out_specs),
        ),
        compiler_params=_compiler_params(),
    )(xp, lh, rh, w_flat, b_col, s_col, h_col)

    if emit_stats:
        y, sums, sqs = res
        return y, l_out, sums, sqs
    return res[0], l_out


# -----------------------------------------------------------------------------
# Strided Conv1d (used once: the stride-7 input conv). Taps are pre-gathered in the
# wrapper into a (K*C_in, TL) slab per tile, so the kernel is a single MXU dot.
# -----------------------------------------------------------------------------
def _conv_taps_kernel(x_ref, w_ref, b_ref, o_ref, *, out_leaky, leaky_slope):
    acc = jnp.dot(w_ref[...], x_ref[...], preferred_element_type=jnp.float32) + b_ref[...]
    if out_leaky:
        acc = jnp.where(acc >= 0, acc, leaky_slope * acc)
    o_ref[...] = acc.astype(o_ref.dtype)


def conv1d_strided_pallas(x, weight, bias, *, stride, padding, leaky_slope=LEAKY_SLOPE,
                          block_l=DEFAULT_BLOCK_L, act_dtype=ACT_DTYPE):
    assert block_l % 128 == 0
    n, c_in, length = x.shape
    c_out, _, ksz = weight.shape
    l_out = (length + 2 * padding - ksz) // stride + 1
    assert l_out > 0
    tl = min(block_l, _round_up(l_out, 128))
    t = pl.cdiv(l_out, tl)
    lp = t * tl

    l_in_needed = (lp - 1) * stride + ksz
    pad_right = max(0, l_in_needed - (length + padding))
    xp = jnp.pad(x, ((0, 0), (0, 0), (padding, pad_right)))[:, :, :l_in_needed]
    xp = xp.astype(act_dtype)
    taps = [xp[:, :, k: k + stride * (lp - 1) + 1: stride] for k in range(ksz)]
    x_in = jnp.stack(taps, axis=0)                                   # (K, N, C_in, lp)
    x_in = (x_in.reshape(ksz, n, c_in, t, tl)
                 .transpose(1, 3, 0, 2, 4)
                 .reshape(n, t, ksz * c_in, tl))                     # (N, T, K*C_in, TL)

    w_flat = jnp.transpose(weight, (0, 2, 1)).reshape(c_out, ksz * c_in).astype(act_dtype)
    b_col = (jnp.zeros((c_out,), jnp.float32) if bias is None
             else bias.astype(jnp.float32)).reshape(c_out, 1)

    y = pl.pallas_call(
        functools.partial(_conv_taps_kernel, out_leaky=True, leaky_slope=leaky_slope),
        out_shape=jax.ShapeDtypeStruct((n, c_out, lp), act_dtype),
        grid_spec=pltpu.PrefetchScalarGridSpec(
            num_scalar_prefetch=0,
            grid=(n, t),
            in_specs=[
                pl.BlockSpec((pl.Squeezed(), pl.Squeezed(), ksz * c_in, tl),
                             lambda b, j: (b, j, 0, 0)),
                pl.BlockSpec((c_out, ksz * c_in), lambda b, j: (0, 0)),
                pl.BlockSpec((c_out, 1), lambda b, j: (0, 0)),
            ],
            out_specs=pl.BlockSpec((pl.Squeezed(), c_out, tl), lambda b, j: (b, 0, j)),
        ),
        compiler_params=_compiler_params(),
    )(x_in, w_flat, b_col)
    return y, l_out


# -----------------------------------------------------------------------------
# Full MulLayerDiscriminator forward.
# -----------------------------------------------------------------------------
def mul_layer_discriminator_forward(params, input1, input2, *,
                                    leaky_slope=LEAKY_SLOPE,
                                    block_l=DEFAULT_BLOCK_L,
                                    act_dtype=ACT_DTYPE):
    n, _, l1 = input1.shape

    # --- DisInputConv --------------------------------------------------------
    x1, l1_out = conv1d_s1_pallas(input1, l1, params["in1_w"], params["in1_b"],
                                  padding=4, out_leaky=True, leaky_slope=leaky_slope,
                                  block_l=block_l, act_dtype=act_dtype)
    x2, l2_out = conv1d_strided_pallas(input2, params["in2_w"], params["in2_b"],
                                       stride=7, padding=1, leaky_slope=leaky_slope,
                                       block_l=block_l, act_dtype=act_dtype)
    assert l2_out >= l1_out, "stream 2 must be at least as long as stream 1 (as in PyTorch)"
    # Crop/pad stream 2 to stream 1's PHYSICAL length; columns >= l1_out are masked
    # downstream by the trunk convs. (Channel concat kept: one small copy.)
    p1 = x1.shape[-1]
    if x2.shape[-1] >= p1:
        x2 = x2[:, :, :p1]
    else:
        x2 = jnp.pad(x2, ((0, 0), (0, 0), (0, p1 - x2.shape[-1])))
    cur = jnp.concatenate([x1, x2], axis=1)
    cur_len = l1_out

    # --- mul_conv trunk: Conv(k=8,p=4,no bias) -> BN (fused stats) -> LeakyReLU -----
    # The BN affine + LeakyReLU of layer i is applied inside layer i+1's conv (and the
    # last one inside output_conv); raw conv outputs are what is stored between layers.
    scale = shift = None
    for layer in params["trunk"]:
        y, l_out, sums, sqs = conv1d_s1_pallas(
            cur, cur_len, layer["w"], None, padding=4,
            in_scale=scale, in_shift=shift, out_leaky=False, emit_stats=True,
            leaky_slope=leaky_slope, block_l=block_l, act_dtype=act_dtype)
        inv_cnt = 1.0 / float(n * l_out)                    # training-mode batch stats
        tot = jnp.sum(sums, axis=(0, 1))[:, 0]
        tot2 = jnp.sum(sqs, axis=(0, 1))[:, 0]
        mean = tot * inv_cnt
        var = jnp.maximum(tot2 * inv_cnt - mean * mean, 0.0)   # biased var, as in torch BN
        scale = layer["gamma"] * lax.rsqrt(var + BN_EPS)
        shift = layer["beta"] - mean * scale
        cur, cur_len = y, l_out

    # --- output_conv (with the last trunk layer's BN affine + LeakyReLU fused in) ----
    out, l_fin = conv1d_s1_pallas(cur, cur_len, params["out_w"], params["out_b"],
                                  padding=1, in_scale=scale, in_shift=shift,
                                  out_leaky=False, emit_stats=False,
                                  leaky_slope=leaky_slope, block_l=block_l,
                                  act_dtype=act_dtype, out_dtype=jnp.float32)
    return out[:, :, :l_fin]


# -----------------------------------------------------------------------------
# Parameters + plain-JAX reference (f32) mirroring the PyTorch module.
# -----------------------------------------------------------------------------
def init_params(key, in1_chan, in2_chan, filter_num=64, layer_num=3):
    def conv_init(k, c_out, c_in, ksz):
        kw, kb = jax.random.split(k)
        s = (c_in * ksz) ** -0.5
        return (s * jax.random.normal(kw, (c_out, c_in, ksz), jnp.float32),
                s * jax.random.normal(kb, (c_out,), jnp.float32))

    n_trunk = min(layer_num, 6)
    keys = jax.random.split(key, 3 + 2 * n_trunk)
    in1_w, in1_b = conv_init(keys[0], filter_num, in1_chan, 9)
    in2_w, in2_b = conv_init(keys[1], filter_num, in2_chan, 9)
    trunk = []
    c_in = filter_num * 2
    for i in range(n_trunk):
        c_out = min(c_in, 1024)
        w, _ = conv_init(keys[2 + 2 * i], c_out, c_in, 8)        # Conv1d(bias=False)
        kg, kb = jax.random.split(keys[3 + 2 * i])
        trunk.append({"w": w,
                      "gamma": 1.0 + 0.1 * jax.random.normal(kg, (c_out,), jnp.float32),
                      "beta": 0.1 * jax.random.normal(kb, (c_out,), jnp.float32)})
        c_in = c_out
    out_w, out_b = conv_init(keys[2 + 2 * n_trunk], 1, c_in, 3)
    return {"in1_w": in1_w, "in1_b": in1_b, "in2_w": in2_w, "in2_b": in2_b,
            "trunk": trunk, "out_w": out_w, "out_b": out_b}


def _leaky(v, slope):
    return jnp.where(v >= 0, v, slope * v)


def _conv1d_ref(x, w, b, stride, padding):
    y = lax.conv_general_dilated(
        x.astype(jnp.float32), w.astype(jnp.float32),
        window_strides=(stride,), padding=[(padding, padding)],
        dimension_numbers=("NCH", "OIH", "NCH"),
        precision=lax.Precision.HIGHEST)
    if b is not None:
        y = y + b.astype(jnp.float32)[None, :, None]
    return y


def discriminator_ref(params, input1, input2, leaky_slope=LEAKY_SLOPE):
    x1 = _leaky(_conv1d_ref(input1, params["in1_w"], params["in1_b"], 1, 4), leaky_slope)
    x2 = _leaky(_conv1d_ref(input2, params["in2_w"], params["in2_b"], 7, 1), leaky_slope)
    x2 = x2[:, :, :x1.shape[2]]
    x = jnp.concatenate([x1, x2], axis=1)
    for layer in params["trunk"]:
        y = _conv1d_ref(x, layer["w"], None, 1, 4)
        mean = jnp.mean(y, axis=(0, 2), keepdims=True)
        var = jnp.var(y, axis=(0, 2), keepdims=True)
        yn = (y - mean) / jnp.sqrt(var + BN_EPS)
        yn = yn * layer["gamma"][None, :, None] + layer["beta"][None, :, None]
        x = _leaky(yn, leaky_slope)
    return _conv1d_ref(x, params["out_w"], params["out_b"], 1, 1)


if __name__ == "__main__":
    N = 2
    IN1_C, IN2_C = 4, 6
    FILTER_NUM, LAYER_NUM = 8, 3

    def run_case(name, l1, l2, act_dtype, block_l, atol, rtol):
        key = jax.random.PRNGKey(0)
        kp, k1, k2 = jax.random.split(key, 3)
        params = init_params(kp, IN1_C, IN2_C, FILTER_NUM, LAYER_NUM)
        input1 = jax.random.normal(k1, (N, IN1_C, l1), dtype=jnp.float32)
        input2 = jax.random.normal(k2, (N, IN2_C, l2), dtype=jnp.float32)
        ref = discriminator_ref(params, input1, input2)
        fwd = jax.jit(functools.partial(mul_layer_discriminator_forward,
                                        act_dtype=act_dtype, block_l=block_l))
        out = jax.block_until_ready(fwd(params, input1, input2))
        assert out.shape == ref.shape, (name, out.shape, ref.shape)
        err = float(jnp.max(jnp.abs(out - ref)))
        assert jnp.allclose(out, ref, atol=atol, rtol=rtol), (name, err)

    # f32 path, single tile per layer: tight check of the kernel logic.
    # L2 chosen so the stride-7 stream is at least as long as stream 1: (112+2-9)//7+1 = 16.
    run_case("f32_single_tile", 16, 112, jnp.float32, 1024, 2e-2, 2e-2)
    # Default bf16 streaming path (f32 accumulation & f32 BN stats): coarse sanity check.
    run_case("bf16_single_tile", 16, 112, jnp.bfloat16, 1024, 0.25, 0.25)
    # f32 path with forced 128-wide tiles: exercises halo stitching + padding/stat masks.
    run_case("f32_multi_tile", 300, 2100, jnp.float32, 128, 2e-2, 2e-2)

    print("KERNEL_OK")
</pallas_src>

<mosaic_0001>
module attributes {stable_mosaic.version = 11 : i64} {
  func.func @_conv_taps_kernel(%arg0: i32, %arg1: i32, %arg2: memref<1x1x54x128xf32, #tpu.memory_space<vmem>>, %arg3: memref<8x54xf32, #tpu.memory_space<vmem>>, %arg4: memref<8x1xf32, #tpu.memory_space<vmem>>, %arg5: memref<1x8x128xf32, #tpu.memory_space<vmem>>) attributes {dimension_semantics = [#tpu.dimension_semantics<parallel>, #tpu.dimension_semantics<parallel>], iteration_bounds = array<i64: 2, 1>, scalar_prefetch = 0 : i64, scratch_operands = 0 : i64, tpu.core_type = #tpu.core_type<tc>, window_params = [{transform_indices = @transform_0, window_bounds = array<i64: 1, 1, 54, 128>}, {pipeline_mode = #tpu.pipeline_mode<synchronous>, transform_indices = @transform_1, window_bounds = array<i64: 8, 54>}, {pipeline_mode = #tpu.pipeline_mode<synchronous>, transform_indices = @transform_2, window_bounds = array<i64: 8, 1>}, {transform_indices = @transform_3, window_bounds = array<i64: 1, 8, 128>}]} {
    %c0 = arith.constant 0 : index
    %c0_0 = arith.constant 0 : index
    %0 = vector.load %arg3[%c0, %c0_0] : memref<8x54xf32, #tpu.memory_space<vmem>>, vector<8x54xf32>
    %c0_1 = arith.constant 0 : index
    %c0_2 = arith.constant 0 : index
    %c0_3 = arith.constant 0 : index
    %c0_4 = arith.constant 0 : index
    %1 = vector.load %arg2[%c0_1, %c0_2, %c0_3, %c0_4] : memref<1x1x54x128xf32, #tpu.memory_space<vmem>>, vector<1x1x54x128xf32>
    %2 = vector.shape_cast %1 : vector<1x1x54x128xf32> to vector<54x128xf32>
    %cst = arith.constant dense<0.000000e+00> : vector<8x128xf32>
    %3 = tpu.matmul %0, %2, %cst {dimension_numbers = #tpu.dot_dimension_numbers<[1], [0], [0], [1], [0, 0, 1, 1], [], []>} : vector<8x54xf32>, vector<54x128xf32>, vector<8x128xf32> -> vector<8x128xf32>
    %c0_5 = arith.constant 0 : index
    %c0_6 = arith.constant 0 : index
    %4 = vector.load %arg4[%c0_5, %c0_6] : memref<8x1xf32, #tpu.memory_space<vmem>>, vector<8x1xf32>
    %5 = vector.broadcast %4 : vector<8x1xf32> to vector<8x128xf32>
    %6 = arith.addf %3, %5 : vector<8x128xf32>
    %cst_7 = arith.constant 0.000000e+00 : f32
    %7 = vector.broadcast %cst_7 : f32 to vector<8x128xf32>
    %8 = arith.cmpf oge, %6, %7 : vector<8x128xf32>
    %cst_8 = arith.constant 2.000000e-01 : f32
    %9 = vector.broadcast %cst_8 : f32 to vector<8x128xf32>
    %10 = arith.mulf %9, %6 : vector<8x128xf32>
    %11 = arith.select %8, %6, %10 : vector<8x128xi1>, vector<8x128xf32>
    %c0_9 = arith.constant 0 : index
    %c0_10 = arith.constant 0 : index
    %c0_11 = arith.constant 0 : index
    %12 = vector.load %arg5[%c0_9, %c0_10, %c0_11] : memref<1x8x128xf32, #tpu.memory_space<vmem>>, vector<1x8x128xf32>
    %13 = vector.shape_cast %12 : vector<1x8x128xf32> to vector<8x128xf32>
    %14 = vector.shape_cast %11 : vector<8x128xf32> to vector<1x8x128xf32>
    tpu.vector_store %arg5[%c0_9, %c0_10, %c0_11], %14 {strides = array<i32>} : memref<1x8x128xf32, #tpu.memory_space<vmem>>, vector<1x8x128xf32>,
    return
  }
  func.func @transform_0(%arg0: i32, %arg1: i32) -> (i32, i32, i32, i32) {
    %c0_i32 = arith.constant 0 : i32
    %c0_i32_0 = arith.constant 0 : i32
    %c0_i32_1 = arith.constant 0 : i32
    return %arg0, %arg1, %c0_i32, %c0_i32_0 : i32, i32, i32, i32
  }
  func.func @transform_1(%arg0: i32, %arg1: i32) -> (i32, i32) {
    %c0_i32 = arith.constant 0 : i32
    %c0_i32_0 = arith.constant 0 : i32
    %c0_i32_1 = arith.constant 0 : i32
    return %c0_i32, %c0_i32_0 : i32, i32
  }
  func.func @transform_2(%arg0: i32, %arg1: i32) -> (i32, i32) {
    %c0_i32 = arith.constant 0 : i32
    %c0_i32_0 = arith.constant 0 : i32
    %c0_i32_1 = arith.constant 0 : i32
    return %c0_i32, %c0_i32_0 : i32, i32
  }
  func.func @transform_3(%arg0: i32, %arg1: i32) -> (i32, i32, i32) {
    %c0_i32 = arith.constant 0 : i32
    %c0_i32_0 = arith.constant 0 : i32
    return %arg0, %c0_i32, %arg1 : i32, i32, i32
  }
}

module attributes {stable_mosaic.version = 11 : i64} {
  func.func @_conv_s1_kernel(%arg0: i32, %arg1: i32, %arg2: memref<1x4x128xf32, #tpu.memory_space<vmem>>, %arg3: memref<1x1x4x4xf32, #tpu.memory_space<vmem>>, %arg4: memref<1x1x4x4xf32, #tpu.memory_space<vmem>>, %arg5: memref<8x36xf32, #tpu.memory_space<vmem>>, %arg6: memref<8x1xf32, #tpu.memory_space<vmem>>, %arg7: memref<4x1xf32, #tpu.memory_space<vmem>>, %arg8: memref<4x1xf32, #tpu.memory_space<vmem>>, %arg9: memref<1x8x128xf32, #tpu.memory_space<vmem>>) attributes {dimension_semantics = [#tpu.dimension_semantics<parallel>, #tpu.dimension_semantics<parallel>], iteration_bounds = array<i64: 2, 1>, scalar_prefetch = 0 : i64, scratch_operands = 0 : i64, tpu.core_type = #tpu.core_type<tc>, window_params = [{transform_indices = @transform_0, window_bounds = array<i64: 1, 4, 128>}, {transform_indices = @transform_1, window_bounds = array<i64: 1, 1, 4, 4>}, {transform_indices = @transform_2, window_bounds = array<i64: 1, 1, 4, 4>}, {pipeline_mode = #tpu.pipeline_mode<synchronous>, transform_indices = @transform_3, window_bounds = array<i64: 8, 36>}, {pipeline_mode = #tpu.pipeline_mode<synchronous>, transform_indices = @transform_4, window_bounds = array<i64: 8, 1>}, {pipeline_mode = #tpu.pipeline_mode<synchronous>, transform_indices = @transform_5, window_bounds = array<i64: 4, 1>}, {pipeline_mode = #tpu.pipeline_mode<synchronous>, transform_indices = @transform_6, window_bounds = array<i64: 4, 1>}, {transform_indices = @transform_7, window_bounds = array<i64: 1, 8, 128>}]} {
    %c0 = arith.constant 0 : index
    %c0_0 = arith.constant 0 : index
    %c0_1 = arith.constant 0 : index
    %c0_2 = arith.constant 0 : index
    %0 = vector.load %arg3[%c0, %c0_0, %c0_1, %c0_2] : memref<1x1x4x4xf32, #tpu.memory_space<vmem>>, vector<1x1x4x4xf32>
    %1 = vector.shape_cast %0 : vector<1x1x4x4xf32> to vector<4x4xf32>
    %c0_3 = arith.constant 0 : index
    %c0_4 = arith.constant 0 : index
    %c0_5 = arith.constant 0 : index
    %2 = vector.load %arg2[%c0_3, %c0_4, %c0_5] : memref<1x4x128xf32, #tpu.memory_space<vmem>>, vector<1x4x128xf32>
    %3 = vector.shape_cast %2 : vector<1x4x128xf32> to vector<4x128xf32>
    %c0_6 = arith.constant 0 : index
    %c0_7 = arith.constant 0 : index
    %c0_8 = arith.constant 0 : index
    %c0_9 = arith.constant 0 : index
    %4 = vector.load %arg4[%c0_6, %c0_7, %c0_8, %c0_9] : memref<1x1x4x4xf32, #tpu.memory_space<vmem>>, vector<1x1x4x4xf32>
    %5 = vector.shape_cast %4 : vector<1x1x4x4xf32> to vector<4x4xf32>
    %6 = tpu.concatenate %1, %3, %5 in 1 : vector<4x4xf32>, vector<4x128xf32>, vector<4x4xf32> -> vector<4x136xf32>
    %c128_i32 = arith.constant 128 : i32
    %7 = arith.muli %arg1, %c128_i32 : i32
    %c4_i32 = arith.constant 4 : i32
    %8 = arith.subi %7, %c4_i32 : i32
    %9 = tpu.iota {dimensions = array<i32: 1>} : vector<1x136xi32>
    %10 = vector.broadcast %8 : i32 to vector<1x136xi32>
    %11 = arith.addi %10, %9 : vector<1x136xi32>
    %c0_i32 = arith.constant 0 : i32
    %12 = vector.broadcast %c0_i32 : i32 to vector<1x136xi32>
    %13 = arith.cmpi sge, %11, %12 : vector<1x136xi32>
    %c16_i32 = arith.constant 16 : i32
    %14 = vector.broadcast %c16_i32 : i32 to vector<1x136xi32>
    %15 = arith.cmpi slt, %11, %14 : vector<1x136xi32>
    %16 = arith.andi %13, %15 : vector<1x136xi1>
    %cst = arith.constant 0.000000e+00 : f32
    %17 = vector.broadcast %cst : f32 to vector<4x136xf32>
    %18 = vector.shape_cast %16 : vector<1x136xi1> to vector<1x136xi1>
    %19 = vector.broadcast %18 : vector<1x136xi1> to vector<4x136xi1>
    %20 = arith.select %19, %6, %17 : vector<4x136xi1>, vector<4x136xf32>
    %21 = vector.extract_strided_slice %20 {offsets = [0, 0], sizes = [4, 128], strides = [1, 1]} : vector<4x136xf32> to vector<4x128xf32>
    %22 = vector.extract_strided_slice %20 {offsets = [0, 1], sizes = [4, 128], strides = [1, 1]} : vector<4x136xf32> to vector<4x128xf32>
    %23 = vector.extract_strided_slice %20 {offsets = [0, 2], sizes = [4, 128], strides = [1, 1]} : vector<4x136xf32> to vector<4x128xf32>
    %24 = vector.extract_strided_slice %20 {offsets = [0, 3], sizes = [4, 128], strides = [1, 1]} : vector<4x136xf32> to vector<4x128xf32>
    %25 = vector.extract_strided_slice %20 {offsets = [0, 4], sizes = [4, 128], strides = [1, 1]} : vector<4x136xf32> to vector<4x128xf32>
    %26 = vector.extract_strided_slice %20 {offsets = [0, 5], sizes = [4, 128], strides = [1, 1]} : vector<4x136xf32> to vector<4x128xf32>
    %27 = vector.extract_strided_slice %20 {offsets = [0, 6], sizes = [4, 128], strides = [1, 1]} : vector<4x136xf32> to vector<4x128xf32>
    %28 = vector.extract_strided_slice %20 {offsets = [0, 7], sizes = [4, 128], strides = [1, 1]} : vector<4x136xf32> to vector<4x128xf32>
    %29 = vector.extract_strided_slice %20 {offsets = [0, 8], sizes = [4, 128], strides = [1, 1]} : vector<4x136xf32> to vector<4x128xf32>
    %30 = tpu.concatenate %21, %22, %23, %24, %25, %26, %27, %28, %29 in 0 : vector<4x128xf32>, vector<4x128xf32>, vector<4x128xf32>, vector<4x128xf32>, vector<4x128xf32>, vector<4x128xf32>, vector<4x128xf32>, vector<4x128xf32>, vector<4x128xf32> -> vector<36x128xf32>
    %c0_10 = arith.constant 0 : index
    %c0_11 = arith.constant 0 : index
    %31 = vector.load %arg5[%c0_10, %c0_11] : memref<8x36xf32, #tpu.memory_space<vmem>>, vector<8x36xf32>
    %cst_12 = arith.constant dense<0.000000e+00> : vector<8x128xf32>
    %32 = tpu.matmul %31, %30, %cst_12 {dimension_numbers = #tpu.dot_dimension_numbers<[1], [0], [0], [1], [0, 0, 1, 1], [], []>} : vector<8x36xf32>, vector<36x128xf32>, vector<8x128xf32> -> vector<8x128xf32>
    %c0_13 = arith.constant 0 : index
    %c0_14 = arith.constant 0 : index
    %33 = vector.load %arg6[%c0_13, %c0_14] : memref<8x1xf32, #tpu.memory_space<vmem>>, vector<8x1xf32>
    %34 = vector.broadcast %33 : vector<8x1xf32> to vector<8x128xf32>
    %35 = arith.addf %32, %34 : vector<8x128xf32>
    %cst_15 = arith.constant 0.000000e+00 : f32
    %36 = vector.broadcast %cst_15 : f32 to vector<8x128xf32>
    %37 = arith.cmpf oge, %35, %36 : vector<8x128xf32>
    %cst_16 = arith.constant 2.000000e-01 : f32
    %38 = vector.broadcast %cst_16 : f32 to vector<8x128xf32>
    %39 = arith.mulf %38, %35 : vector<8x128xf32>
    %40 = arith.select %37, %35, %39 : vector<8x128xi1>, vector<8x128xf32>
    %c0_17 = arith.constant 0 : index
    %c0_18 = arith.constant 0 : index
    %c0_19 = arith.constant 0 : index
    %41 = vector.load %arg9[%c0_17, %c0_18, %c0_19] : memref<1x8x128xf32, #tpu.memory_space<vmem>>, vector<1x8x128xf32>
    %42 = vector.shape_cast %41 : vector<1x8x128xf32> to vector<8x128xf32>
    %43 = vector.shape_cast %40 : vector<8x128xf32> to vector<1x8x128xf32>
    tpu.vector_store %arg9[%c0_17, %c0_18, %c0_19], %43 {strides = array<i32>} : memref<1x8x128xf32, #tpu.memory_space<vmem>>, vector<1x8x128xf32>,
    return
  }
  func.func @transform_0(%arg0: i32, %arg1: i32) -> (i32, i32, i32) {
    %c0_i32 = arith.constant 0 : i32
    %c0_i32_0 = arith.constant 0 : i32
    return %arg0, %c0_i32, %arg1 : i32, i32, i32
  }
  func.func @transform_1(%arg0: i32, %arg1: i32) -> (i32, i32, i32, i32) {
    %c0_i32 = arith.constant 0 : i32
    %c0_i32_0 = arith.constant 0 : i32
    %c0_i32_1 = arith.constant 0 : i32
    return %arg0, %arg1, %c0_i32, %c0_i32_0 : i32, i32, i32, i32
  }
  func.func @transform_2(%arg0: i32, %arg1: i32) -> (i32, i32, i32, i32) {
    %c0_i32 = arith.constant 0 : i32
    %c0_i32_0 = arith.constant 0 : i32
    %c0_i32_1 = arith.constant 0 : i32
    return %arg0, %arg1, %c0_i32, %c0_i32_0 : i32, i32, i32, i32
  }
  func.func @transform_3(%arg0: i32, %arg1: i32) -> (i32, i32) {
    %c0_i32 = arith.constant 0 : i32
    %c0_i32_0 = arith.constant 0 : i32
    %c0_i32_1 = arith.constant 0 : i32
    return %c0_i32, %c0_i32_0 : i32, i32
  }
  func.func @transform_4(%arg0: i32, %arg1: i32) -> (i32, i32) {
    %c0_i32 = arith.constant 0 : i32
    %c0_i32_0 = arith.constant 0 : i32
    %c0_i32_1 = arith.constant 0 : i32
    return %c0_i32, %c0_i32_0 : i32, i32
  }
  func.func @transform_5(%arg0: i32, %arg1: i32) -> (i32, i32) {
    %c0_i32 = arith.constant 0 : i32
    %c0_i32_0 = arith.constant 0 : i32
    %c0_i32_1 = arith.constant 0 : i32
    return %c0_i32, %c0_i32_0 : i32, i32
  }
  func.func @transform_6(%arg0: i32, %arg1: i32) -> (i32, i32) {
    %c0_i32 = arith.constant 0 : i32
    %c0_i32_0 = arith.constant 0 : i32
    %c0_i32_1 = arith.constant 0 : i32
    return %c0_i32, %c0_i32_0 : i32, i32
  }
  func.func @transform_7(%arg0: i32, %arg1: i32) -> (i32, i32, i32) {
    %c0_i32 = arith.constant 0 : i32
    %c0_i32_0 = arith.constant 0 : i32
    return %arg0, %c0_i32, %arg1 : i32, i32, i32
  }
}

module attributes {stable_mosaic.version = 11 : i64} {
  func.func @_conv_s1_kernel(%arg0: i32, %arg1: i32, %arg2: memref<1x16x128xf32, #tpu.memory_space<vmem>>, %arg3: memref<1x1x16x4xf32, #tpu.memory_space<vmem>>, %arg4: memref<1x1x16x3xf32, #tpu.memory_space<vmem>>, %arg5: memref<16x128xf32, #tpu.memory_space<vmem>>, %arg6: memref<16x1xf32, #tpu.memory_space<vmem>>, %arg7: memref<16x1xf32, #tpu.memory_space<vmem>>, %arg8: memref<16x1xf32, #tpu.memory_space<vmem>>, %arg9: memref<1x16x128xf32, #tpu.memory_space<vmem>>, %arg10: memref<1x1x16x1xf32, #tpu.memory_space<vmem>>, %arg11: memref<1x1x16x1xf32, #tpu.memory_space<vmem>>) attributes {dimension_semantics = [#tpu.dimension_semantics<parallel>, #tpu.dimension_semantics<parallel>], iteration_bounds = array<i64: 2, 1>, scalar_prefetch = 0 : i64, scratch_operands = 0 : i64, tpu.core_type = #tpu.core_type<tc>, window_params = [{transform_indices = @transform_0, window_bounds = array<i64: 1, 16, 128>}, {transform_indices = @transform_1, window_bounds = array<i64: 1, 1, 16, 4>}, {transform_indices = @transform_2, window_bounds = array<i64: 1, 1, 16, 3>}, {pipeline_mode = #tpu.pipeline_mode<synchronous>, transform_indices = @transform_3, window_bounds = array<i64: 16, 128>}, {pipeline_mode = #tpu.pipeline_mode<synchronous>, transform_indices = @transform_4, window_bounds = array<i64: 16, 1>}, {pipeline_mode = #tpu.pipeline_mode<synchronous>, transform_indices = @transform_5, window_bounds = array<i64: 16, 1>}, {pipeline_mode = #tpu.pipeline_mode<synchronous>, transform_indices = @transform_6, window_bounds = array<i64: 16, 1>}, {transform_indices = @transform_7, window_bounds = array<i64: 1, 16, 128>}, {transform_indices = @transform_8, window_bounds = array<i64: 1, 1, 16, 1>}, {transform_indices = @transform_9, window_bounds = array<i64: 1, 1, 16, 1>}]} {
    %c0 = arith.constant 0 : index
    %c0_0 = arith.constant 0 : index
    %c0_1 = arith.constant 0 : index
    %c0_2 = arith.constant 0 : index
    %0 = vector.load %arg3[%c0, %c0_0, %c0_1, %c0_2] : memref<1x1x16x4xf32, #tpu.memory_space<vmem>>, vector<1x1x16x4xf32>
    %1 = vector.shape_cast %0 : vector<1x1x16x4xf32> to vector<16x4xf32>
    %c0_3 = arith.constant 0 : index
    %c0_4 = arith.constant 0 : index
    %c0_5 = arith.constant 0 : index
    %2 = vector.load %arg2[%c0_3, %c0_4, %c0_5] : memref<1x16x128xf32, #tpu.memory_space<vmem>>, vector<1x16x128xf32>
    %3 = vector.shape_cast %2 : vector<1x16x128xf32> to vector<16x128xf32>
    %c0_6 = arith.constant 0 : index
    %c0_7 = arith.constant 0 : index
    %c0_8 = arith.constant 0 : index
    %c0_9 = arith.constant 0 : index
    %4 = vector.load %arg4[%c0_6, %c0_7, %c0_8, %c0_9] : memref<1x1x16x3xf32, #tpu.memory_space<vmem>>, vector<1x1x16x3xf32>
    %5 = vector.shape_cast %4 : vector<1x1x16x3xf32> to vector<16x3xf32>
    %6 = tpu.concatenate %1, %3, %5 in 1 : vector<16x4xf32>, vector<16x128xf32>, vector<16x3xf32> -> vector<16x135xf32>
    %c128_i32 = arith.constant 128 : i32
    %7 = arith.muli %arg1, %c128_i32 : i32
    %c4_i32 = arith.constant 4 : i32
    %8 = arith.subi %7, %c4_i32 : i32
    %9 = tpu.iota {dimensions = array<i32: 1>} : vector<1x135xi32>
    %10 = vector.broadcast %8 : i32 to vector<1x135xi32>
    %11 = arith.addi %10, %9 : vector<1x135xi32>
    %c0_i32 = arith.constant 0 : i32
    %12 = vector.broadcast %c0_i32 : i32 to vector<1x135xi32>
    %13 = arith.cmpi sge, %11, %12 : vector<1x135xi32>
    %c16_i32 = arith.constant 16 : i32
    %14 = vector.broadcast %c16_i32 : i32 to vector<1x135xi32>
    %15 = arith.cmpi slt, %11, %14 : vector<1x135xi32>
    %16 = arith.andi %13, %15 : vector<1x135xi1>
    %cst = arith.constant 0.000000e+00 : f32
    %17 = vector.broadcast %cst : f32 to vector<16x135xf32>
    %18 = vector.shape_cast %16 : vector<1x135xi1> to vector<1x135xi1>
    %19 = vector.broadcast %18 : vector<1x135xi1> to vector<16x135xi1>
    %20 = arith.select %19, %6, %17 : vector<16x135xi1>, vector<16x135xf32>
    %21 = vector.extract_strided_slice %20 {offsets = [0, 0], sizes = [16, 128], strides = [1, 1]} : vector<16x135xf32> to vector<16x128xf32>
    %22 = vector.extract_strided_slice %20 {offsets = [0, 1], sizes = [16, 128], strides = [1, 1]} : vector<16x135xf32> to vector<16x128xf32>
    %23 = vector.extract_strided_slice %20 {offsets = [0, 2], sizes = [16, 128], strides = [1, 1]} : vector<16x135xf32> to vector<16x128xf32>
    %24 = vector.extract_strided_slice %20 {offsets = [0, 3], sizes = [16, 128], strides = [1, 1]} : vector<16x135xf32> to vector<16x128xf32>
    %25 = vector.extract_strided_slice %20 {offsets = [0, 4], sizes = [16, 128], strides = [1, 1]} : vector<16x135xf32> to vector<16x128xf32>
    %26 = vector.extract_strided_slice %20 {offsets = [0, 5], sizes = [16, 128], strides = [1, 1]} : vector<16x135xf32> to vector<16x128xf32>
    %27 = vector.extract_strided_slice %20 {offsets = [0, 6], sizes = [16, 128], strides = [1, 1]} : vector<16x135xf32> to vector<16x128xf32>
    %28 = vector.extract_strided_slice %20 {offsets = [0, 7], sizes = [16, 128], strides = [1, 1]} : vector<16x135xf32> to vector<16x128xf32>
    %29 = tpu.concatenate %21, %22, %23, %24, %25, %26, %27, %28 in 0 : vector<16x128xf32>, vector<16x128xf32>, vector<16x128xf32>, vector<16x128xf32>, vector<16x128xf32>, vector<16x128xf32>, vector<16x128xf32>, vector<16x128xf32> -> vector<128x128xf32>
    %c0_10 = arith.constant 0 : index
    %c0_11 = arith.constant 0 : index
    %30 = vector.load %arg5[%c0_10, %c0_11] : memref<16x128xf32, #tpu.memory_space<vmem>>, vector<16x128xf32>
    %cst_12 = arith.constant dense<0.000000e+00> : vector<16x128xf32>
    %31 = tpu.matmul %30, %29, %cst_12 {dimension_numbers = #tpu.dot_dimension_numbers<[1], [0], [0], [1], [0, 0, 1, 1], [], []>} : vector<16x128xf32>, vector<128x128xf32>, vector<16x128xf32> -> vector<16x128xf32>
    %c0_13 = arith.constant 0 : index
    %c0_14 = arith.constant 0 : index
    %32 = vector.load %arg6[%c0_13, %c0_14] : memref<16x1xf32, #tpu.memory_space<vmem>>, vector<16x1xf32>
    %33 = vector.broadcast %32 : vector<16x1xf32> to vector<16x128xf32>
    %34 = arith.addf %31, %33 : vector<16x128xf32>
    %c0_15 = arith.constant 0 : index
    %c0_16 = arith.constant 0 : index
    %c0_17 = arith.constant 0 : index
    %35 = vector.load %arg9[%c0_15, %c0_16, %c0_17] : memref<1x16x128xf32, #tpu.memory_space<vmem>>, vector<1x16x128xf32>
    %36 = vector.shape_cast %35 : vector<1x16x128xf32> to vector<16x128xf32>
    %37 = vector.shape_cast %34 : vector<16x128xf32> to vector<1x16x128xf32>
    tpu.vector_store %arg9[%c0_15, %c0_16, %c0_17], %37 {strides = array<i32>} : memref<1x16x128xf32, #tpu.memory_space<vmem>>, vector<1x16x128xf32>,
    %c128_i32_18 = arith.constant 128 : i32
    %38 = arith.muli %arg1, %c128_i32_18 : i32
    %39 = tpu.iota {dimensions = array<i32: 1>} : vector<1x128xi32>
    %40 = vector.broadcast %38 : i32 to vector<1x128xi32>
    %41 = arith.addi %40, %39 : vector<1x128xi32>
    %c17_i32 = arith.constant 17 : i32
    %42 = vector.broadcast %c17_i32 : i32 to vector<1x128xi32>
    %43 = arith.cmpi slt, %41, %42 : vector<1x128xi32>
    %44 = arith.extui %43 : vector<1x128xi1> to vector<1x128xi32>
    %45 = arith.sitofp %44 : vector<1x128xi32> to vector<1x128xf32>
    %46 = vector.broadcast %45 : vector<1x128xf32> to vector<16x128xf32>
    %47 = arith.mulf %34, %46 : vector<16x128xf32>
    %cst_19 = arith.constant dense<0.000000e+00> : vector<16xf32>
    %48 = vector.multi_reduction <add>, %47, %cst_19 [1] : vector<16x128xf32> to vector<16xf32>
    %49 = vector.shape_cast %48 : vector<16xf32> to vector<16x1xf32>
    %c0_20 = arith.constant 0 : index
    %c0_21 = arith.constant 0 : index
    %c0_22 = arith.constant 0 : index
    %c0_23 = arith.constant 0 : index
    %50 = vector.load %arg10[%c0_20, %c0_21, %c0_22, %c0_23] : memref<1x1x16x1xf32, #tpu.memory_space<vmem>>, vector<1x1x16x1xf32>
    %51 = vector.shape_cast %50 : vector<1x1x16x1xf32> to vector<16x1xf32>
    %52 = vector.shape_cast %49 : vector<16x1xf32> to vector<1x1x16x1xf32>
    tpu.vector_store %arg10[%c0_20, %c0_21, %c0_22, %c0_23], %52 {strides = array<i32>} : memref<1x1x16x1xf32, #tpu.memory_space<vmem>>, vector<1x1x16x1xf32>,
    %53 = arith.mulf %47, %47 : vector<16x128xf32>
    %cst_24 = arith.constant dense<0.000000e+00> : vector<16xf32>
    %54 = vector.multi_reduction <add>, %53, %cst_24 [1] : vector<16x128xf32> to vector<16xf32>
    %55 = vector.shape_cast %54 : vector<16xf32> to vector<16x1xf32>
    %c0_25 = arith.constant 0 : index
    %c0_26 = arith.constant 0 : index
    %c0_27 = arith.constant 0 : index
    %c0_28 = arith.constant 0 : index
    %56 = vector.load %arg11[%c0_25, %c0_26, %c0_27, %c0_28] : memref<1x1x16x1xf32, #tpu.memory_space<vmem>>, vector<1x1x16x1xf32>
    %57 = vector.shape_cast %56 : vector<1x1x16x1xf32> to vector<16x1xf32>
    %58 = vector.shape_cast %55 : vector<16x1xf32> to vector<1x1x16x1xf32>
    tpu.vector_store %arg11[%c0_25, %c0_26, %c0_27, %c0_28], %58 {strides = array<i32>} : memref<1x1x16x1xf32, #tpu.memory_space<vmem>>, vector<1x1x16x1xf32>,
    return
  }
  func.func @transform_0(%arg0: i32, %arg1: i32) -> (i32, i32, i32) {
    %c0_i32 = arith.constant 0 : i32
    %c0_i32_0 = arith.constant 0 : i32
    return %arg0, %c0_i32, %arg1 : i32, i32, i32
  }
  func.func @transform_1(%arg0: i32, %arg1: i32) -> (i32, i32, i32, i32) {
    %c0_i32 = arith.constant 0 : i32
    %c0_i32_0 = arith.constant 0 : i32
    %c0_i32_1 = arith.constant 0 : i32
    return %arg0, %arg1, %c0_i32, %c0_i32_0 : i32, i32, i32, i32
  }
  func.func @transform_2(%arg0: i32, %arg1: i32) -> (i32, i32, i32, i32) {
    %c0_i32 = arith.constant 0 : i32
    %c0_i32_0 = arith.constant 0 : i32
    %c0_i32_1 = arith.constant 0 : i32
    return %arg0, %arg1, %c0_i32, %c0_i32_0 : i32, i32, i32, i32
  }
  func.func @transform_3(%arg0: i32, %arg1: i32) -> (i32, i32) {
    %c0_i32 = arith.constant 0 : i32
    %c0_i32_0 = arith.constant 0 : i32
    %c0_i32_1 = arith.constant 0 : i32
    return %c0_i32, %c0_i32_0 : i32, i32
  }
  func.func @transform_4(%arg0: i32, %arg1: i32) -> (i32, i32) {
    %c0_i32 = arith.constant 0 : i32
    %c0_i32_0 = arith.constant 0 : i32
    %c0_i32_1 = arith.constant 0 : i32
    return %c0_i32, %c0_i32_0 : i32, i32
  }
  func.func @transform_5(%arg0: i32, %arg1: i32) -> (i32, i32) {
    %c0_i32 = arith.constant 0 : i32
    %c0_i32_0 = arith.constant 0 : i32
    %c0_i32_1 = arith.constant 0 : i32
    return %c0_i32, %c0_i32_0 : i32, i32
  }
  func.func @transform_6(%arg0: i32, %arg1: i32) -> (i32, i32) {
    %c0_i32 = arith.constant 0 : i32
    %c0_i32_0 = arith.constant 0 : i32
    %c0_i32_1 = arith.constant 0 : i32
    return %c0_i32, %c0_i32_0 : i32, i32
  }
  func.func @transform_7(%arg0: i32, %arg1: i32) -> (i32, i32, i32) {
    %c0_i32 = arith.constant 0 : i32
    %c0_i32_0 = arith.constant 0 : i32
    return %arg0, %c0_i32, %arg1 : i32, i32, i32
  }
  func.func @transform_8(%arg0: i32, %arg1: i32) -> (i32, i32, i32, i32) {
    %c0_i32 = arith.constant 0 : i32
    %c0_i32_0 = arith.constant 0 : i32
    %c0_i32_1 = arith.constant 0 : i32
    return %arg0, %arg1, %c0_i32, %c0_i32_0 : i32, i32, i32, i32
  }
  func.func @transform_9(%arg0: i32, %arg1: i32) -> (i32, i32, i32, i32) {
    %c0_i32 = arith.constant 0 : i32
    %c0_i32_0 = arith.constant 0 : i32
    %c0_i32_1 = arith.constant 0 : i32
    return %arg0, %arg1, %c0_i32, %c0_i32_0 : i32, i32, i32, i32
  }
}

module attributes {stable_mosaic.version = 11 : i64} {
  func.func @_conv_s1_kernel(%arg0: i32, %arg1: i32, %arg2: memref<1x16x128xf32, #tpu.memory_space<vmem>>, %arg3: memref<1x1x16x4xf32, #tpu.memory_space<vmem>>, %arg4: memref<1x1x16x3xf32, #tpu.memory_space<vmem>>, %arg5: memref<16x128xf32, #tpu.memory_space<vmem>>, %arg6: memref<16x1xf32, #tpu.memory_space<vmem>>, %arg7: memref<16x1xf32, #tpu.memory_space<vmem>>, %arg8: memref<16x1xf32, #tpu.memory_space<vmem>>, %arg9: memref<1x16x128xf32, #tpu.memory_space<vmem>>, %arg10: memref<1x1x16x1xf32, #tpu.memory_space<vmem>>, %arg11: memref<1x1x16x1xf32, #tpu.memory_space<vmem>>) attributes {dimension_semantics = [#tpu.dimension_semantics<parallel>, #tpu.dimension_semantics<parallel>], iteration_bounds = array<i64: 2, 1>, scalar_prefetch = 0 : i64, scratch_operands = 0 : i64, tpu.core_type = #tpu.core_type<tc>, window_params = [{transform_indices = @transform_0, window_bounds = array<i64: 1, 16, 128>}, {transform_indices = @transform_1, window_bounds = array<i64: 1, 1, 16, 4>}, {transform_indices = @transform_2, window_bounds = array<i64: 1, 1, 16, 3>}, {pipeline_mode = #tpu.pipeline_mode<synchronous>, transform_indices = @transform_3, window_bounds = array<i64: 16, 128>}, {pipeline_mode = #tpu.pipeline_mode<synchronous>, transform_indices = @transform_4, window_bounds = array<i64: 16, 1>}, {pipeline_mode = #tpu.pipeline_mode<synchronous>, transform_indices = @transform_5, window_bounds = array<i64: 16, 1>}, {pipeline_mode = #tpu.pipeline_mode<synchronous>, transform_indices = @transform_6, window_bounds = array<i64: 16, 1>}, {transform_indices = @transform_7, window_bounds = array<i64: 1, 16, 128>}, {transform_indices = @transform_8, window_bounds = array<i64: 1, 1, 16, 1>}, {transform_indices = @transform_9, window_bounds = array<i64: 1, 1, 16, 1>}]} {
    %c0 = arith.constant 0 : index
    %c0_0 = arith.constant 0 : index
    %c0_1 = arith.constant 0 : index
    %c0_2 = arith.constant 0 : index
    %0 = vector.load %arg3[%c0, %c0_0, %c0_1, %c0_2] : memref<1x1x16x4xf32, #tpu.memory_space<vmem>>, vector<1x1x16x4xf32>
    %1 = vector.shape_cast %0 : vector<1x1x16x4xf32> to vector<16x4xf32>
    %c0_3 = arith.constant 0 : index
    %c0_4 = arith.constant 0 : index
    %c0_5 = arith.constant 0 : index
    %2 = vector.load %arg2[%c0_3, %c0_4, %c0_5] : memref<1x16x128xf32, #tpu.memory_space<vmem>>, vector<1x16x128xf32>
    %3 = vector.shape_cast %2 : vector<1x16x128xf32> to vector<16x128xf32>
    %c0_6 = arith.constant 0 : index
    %c0_7 = arith.constant 0 : index
    %c0_8 = arith.constant 0 : index
    %c0_9 = arith.constant 0 : index
    %4 = vector.load %arg4[%c0_6, %c0_7, %c0_8, %c0_9] : memref<1x1x16x3xf32, #tpu.memory_space<vmem>>, vector<1x1x16x3xf32>
    %5 = vector.shape_cast %4 : vector<1x1x16x3xf32> to vector<16x3xf32>
    %6 = tpu.concatenate %1, %3, %5 in 1 : vector<16x4xf32>, vector<16x128xf32>, vector<16x3xf32> -> vector<16x135xf32>
    %c128_i32 = arith.constant 128 : i32
    %7 = arith.muli %arg1, %c128_i32 : i32
    %c4_i32 = arith.constant 4 : i32
    %8 = arith.subi %7, %c4_i32 : i32
    %9 = tpu.iota {dimensions = array<i32: 1>} : vector<1x135xi32>
    %10 = vector.broadcast %8 : i32 to vector<1x135xi32>
    %11 = arith.addi %10, %9 : vector<1x135xi32>
    %c0_i32 = arith.constant 0 : i32
    %12 = vector.broadcast %c0_i32 : i32 to vector<1x135xi32>
    %13 = arith.cmpi sge, %11, %12 : vector<1x135xi32>
    %c18_i32 = arith.constant 18 : i32
    %14 = vector.broadcast %c18_i32 : i32 to vector<1x135xi32>
    %15 = arith.cmpi slt, %11, %14 : vector<1x135xi32>
    %16 = arith.andi %13, %15 : vector<1x135xi1>
    %c0_10 = arith.constant 0 : index
    %c0_11 = arith.constant 0 : index
    %17 = vector.load %arg7[%c0_10, %c0_11] : memref<16x1xf32, #tpu.memory_space<vmem>>, vector<16x1xf32>
    %18 = vector.broadcast %17 : vector<16x1xf32> to vector<16x135xf32>
    %19 = arith.mulf %6, %18 : vector<16x135xf32>
    %c0_12 = arith.constant 0 : index
    %c0_13 = arith.constant 0 : index
    %20 = vector.load %arg8[%c0_12, %c0_13] : memref<16x1xf32, #tpu.memory_space<vmem>>, vector<16x1xf32>
    %21 = vector.broadcast %20 : vector<16x1xf32> to vector<16x135xf32>
    %22 = arith.addf %19, %21 : vector<16x135xf32>
    %cst = arith.constant 0.000000e+00 : f32
    %23 = vector.broadcast %cst : f32 to vector<16x135xf32>
    %24 = arith.cmpf oge, %22, %23 : vector<16x135xf32>
    %cst_14 = arith.constant 2.000000e-01 : f32
    %25 = vector.broadcast %cst_14 : f32 to vector<16x135xf32>
    %26 = arith.mulf %25, %22 : vector<16x135xf32>
    %27 = arith.select %24, %22, %26 : vector<16x135xi1>, vector<16x135xf32>
    %cst_15 = arith.constant 0.000000e+00 : f32
    %28 = vector.broadcast %cst_15 : f32 to vector<16x135xf32>
    %29 = vector.shape_cast %16 : vector<1x135xi1> to vector<1x135xi1>
    %30 = vector.broadcast %29 : vector<1x135xi1> to vector<16x135xi1>
    %31 = arith.select %30, %27, %28 : vector<16x135xi1>, vector<16x135xf32>
    %32 = vector.extract_strided_slice %31 {offsets = [0, 0], sizes = [16, 128], strides = [1, 1]} : vector<16x135xf32> to vector<16x128xf32>
    %33 = vector.extract_strided_slice %31 {offsets = [0, 1], sizes = [16, 128], strides = [1, 1]} : vector<16x135xf32> to vector<16x128xf32>
    %34 = vector.extract_strided_slice %31 {offsets = [0, 2], sizes = [16, 128], strides = [1, 1]} : vector<16x135xf32> to vector<16x128xf32>
    %35 = vector.extract_strided_slice %31 {offsets = [0, 3], sizes = [16, 128], strides = [1, 1]} : vector<16x135xf32> to vector<16x128xf32>
    %36 = vector.extract_strided_slice %31 {offsets = [0, 4], sizes = [16, 128], strides = [1, 1]} : vector<16x135xf32> to vector<16x128xf32>
    %37 = vector.extract_strided_slice %31 {offsets = [0, 5], sizes = [16, 128], strides = [1, 1]} : vector<16x135xf32> to vector<16x128xf32>
    %38 = vector.extract_strided_slice %31 {offsets = [0, 6], sizes = [16, 128], strides = [1, 1]} : vector<16x135xf32> to vector<16x128xf32>
    %39 = vector.extract_strided_slice %31 {offsets = [0, 7], sizes = [16, 128], strides = [1, 1]} : vector<16x135xf32> to vector<16x128xf32>
    %40 = tpu.concatenate %32, %33, %34, %35, %36, %37, %38, %39 in 0 : vector<16x128xf32>, vector<16x128xf32>, vector<16x128xf32>, vector<16x128xf32>, vector<16x128xf32>, vector<16x128xf32>, vector<16x128xf32>, vector<16x128xf32> -> vector<128x128xf32>
    %c0_16 = arith.constant 0 : index
    %c0_17 = arith.constant 0 : index
    %41 = vector.load %arg5[%c0_16, %c0_17] : memref<16x128xf32, #tpu.memory_space<vmem>>, vector<16x128xf32>
    %cst_18 = arith.constant dense<0.000000e+00> : vector<16x128xf32>
    %42 = tpu.matmul %41, %40, %cst_18 {dimension_numbers = #tpu.dot_dimension_numbers<[1], [0], [0], [1], [0, 0, 1, 1], [], []>} : vector<16x128xf32>, vector<128x128xf32>, vector<16x128xf32> -> vector<16x128xf32>
    %c0_19 = arith.constant 0 : index
    %c0_20 = arith.constant 0 : index
    %43 = vector.load %arg6[%c0_19, %c0_20] : memref<16x1xf32, #tpu.memory_space<vmem>>, vector<16x1xf32>
    %44 = vector.broadcast %43 : vector<16x1xf32> to vector<16x128xf32>
    %45 = arith.addf %42, %44 : vector<16x128xf32>
    %c0_21 = arith.constant 0 : index
    %c0_22 = arith.constant 0 : index
    %c0_23 = arith.constant 0 : index
    %46 = vector.load %arg9[%c0_21, %c0_22, %c0_23] : memref<1x16x128xf32, #tpu.memory_space<vmem>>, vector<1x16x128xf32>
    %47 = vector.shape_cast %46 : vector<1x16x128xf32> to vector<16x128xf32>
    %48 = vector.shape_cast %45 : vector<16x128xf32> to vector<1x16x128xf32>
    tpu.vector_store %arg9[%c0_21, %c0_22, %c0_23], %48 {strides = array<i32>} : memref<1x16x128xf32, #tpu.memory_space<vmem>>, vector<1x16x128xf32>,
    %c128_i32_24 = arith.constant 128 : i32
    %49 = arith.muli %arg1, %c128_i32_24 : i32
    %50 = tpu.iota {dimensions = array<i32: 1>} : vector<1x128xi32>
    %51 = vector.broadcast %49 : i32 to vector<1x128xi32>
    %52 = arith.addi %51, %50 : vector<1x128xi32>
    %c19_i32 = arith.constant 19 : i32
    %53 = vector.broadcast %c19_i32 : i32 to vector<1x128xi32>
    %54 = arith.cmpi slt, %52, %53 : vector<1x128xi32>
    %55 = arith.extui %54 : vector<1x128xi1> to vector<1x128xi32>
    %56 = arith.sitofp %55 : vector<1x128xi32> to vector<1x128xf32>
    %57 = vector.broadcast %56 : vector<1x128xf32> to vector<16x128xf32>
    %58 = arith.mulf %45, %57 : vector<16x128xf32>
    %cst_25 = arith.constant dense<0.000000e+00> : vector<16xf32>
    %59 = vector.multi_reduction <add>, %58, %cst_25 [1] : vector<16x128xf32> to vector<16xf32>
    %60 = vector.shape_cast %59 : vector<16xf32> to vector<16x1xf32>
    %c0_26 = arith.constant 0 : index
    %c0_27 = arith.constant 0 : index
    %c0_28 = arith.constant 0 : index
    %c0_29 = arith.constant 0 : index
    %61 = vector.load %arg10[%c0_26, %c0_27, %c0_28, %c0_29] : memref<1x1x16x1xf32, #tpu.memory_space<vmem>>, vector<1x1x16x1xf32>
    %62 = vector.shape_cast %61 : vector<1x1x16x1xf32> to vector<16x1xf32>
    %63 = vector.shape_cast %60 : vector<16x1xf32> to vector<1x1x16x1xf32>
    tpu.vector_store %arg10[%c0_26, %c0_27, %c0_28, %c0_29], %63 {strides = array<i32>} : memref<1x1x16x1xf32, #tpu.memory_space<vmem>>, vector<1x1x16x1xf32>,
    %64 = arith.mulf %58, %58 : vector<16x128xf32>
    %cst_30 = arith.constant dense<0.000000e+00> : vector<16xf32>
    %65 = vector.multi_reduction <add>, %64, %cst_30 [1] : vector<16x128xf32> to vector<16xf32>
    %66 = vector.shape_cast %65 : vector<16xf32> to vector<16x1xf32>
    %c0_31 = arith.constant 0 : index
    %c0_32 = arith.constant 0 : index
    %c0_33 = arith.constant 0 : index
    %c0_34 = arith.constant 0 : index
    %67 = vector.load %arg11[%c0_31, %c0_32, %c0_33, %c0_34] : memref<1x1x16x1xf32, #tpu.memory_space<vmem>>, vector<1x1x16x1xf32>
    %68 = vector.shape_cast %67 : vector<1x1x16x1xf32> to vector<16x1xf32>
    %69 = vector.shape_cast %66 : vector<16x1xf32> to vector<1x1x16x1xf32>
    tpu.vector_store %arg11[%c0_31, %c0_32, %c0_33, %c0_34], %69 {strides = array<i32>} : memref<1x1x16x1xf32, #tpu.memory_space<vmem>>, vector<1x1x16x1xf32>,
    return
  }
  func.func @transform_0(%arg0: i32, %arg1: i32) -> (i32, i32, i32) {
    %c0_i32 = arith.constant 0 : i32
    %c0_i32_0 = arith.constant 0 : i32
    return %arg0, %c0_i32, %arg1 : i32, i32, i32
  }
  func.func @transform_1(%arg0: i32, %arg1: i32) -> (i32, i32, i32, i32) {
    %c0_i32 = arith.constant 0 : i32
    %c0_i32_0 = arith.constant 0 : i32
    %c0_i32_1 = arith.constant 0 : i32
    return %arg0, %arg1, %c0_i32, %c0_i32_0 : i32, i32, i32, i32
  }
  func.func @transform_2(%arg0: i32, %arg1: i32) -> (i32, i32, i32, i32) {
    %c0_i32 = arith.constant 0 : i32
    %c0_i32_0 = arith.constant 0 : i32
    %c0_i32_1 = arith.constant 0 : i32
    return %arg0, %arg1, %c0_i32, %c0_i32_0 : i32, i32, i32, i32
  }
  func.func @transform_3(%arg0: i32, %arg1: i32) -> (i32, i32) {
    %c0_i32 = arith.constant 0 : i32
    %c0_i32_0 = arith.constant 0 : i32
    %c0_i32_1 = arith.constant 0 : i32
    return %c0_i32, %c0_i32_0 : i32, i32
  }
  func.func @transform_4(%arg0: i32, %arg1: i32) -> (i32, i32) {
    %c0_i32 = arith.constant 0 : i32
    %c0_i32_0 = arith.constant 0 : i32
    %c0_i32_1 = arith.constant 0 : i32
    return %c0_i32, %c0_i32_0 : i32, i32
  }
  func.func @transform_5(%arg0: i32, %arg1: i32) -> (i32, i32) {
    %c0_i32 = arith.constant 0 : i32
    %c0_i32_0 = arith.constant 0 : i32
    %c0_i32_1 = arith.constant 0 : i32
    return %c0_i32, %c0_i32_0 : i32, i32
  }
  func.func @transform_6(%arg0: i32, %arg1: i32) -> (i32, i32) {
    %c0_i32 = arith.constant 0 : i32
    %c0_i32_0 = arith.constant 0 : i32
    %c0_i32_1 = arith.constant 0 : i32
    return %c0_i32, %c0_i32_0 : i32, i32
  }
  func.func @transform_7(%arg0: i32, %arg1: i32) -> (i32, i32, i32) {
    %c0_i32 = arith.constant 0 : i32
    %c0_i32_0 = arith.constant 0 : i32
    return %arg0, %c0_i32, %arg1 : i32, i32, i32
  }
  func.func @transform_8(%arg0: i32, %arg1: i32) -> (i32, i32, i32, i32) {
    %c0_i32 = arith.constant 0 : i32
    %c0_i32_0 = arith.constant 0 : i32
    %c0_i32_1 = arith.constant 0 : i32
    return %arg0, %arg1, %c0_i32, %c0_i32_0 : i32, i32, i32, i32
  }
  func.func @transform_9(%arg0: i32, %arg1: i32) -> (i32, i32, i32, i32) {
    %c0_i32 = arith.constant 0 : i32
    %c0_i32_0 = arith.constant 0 : i32
    %c0_i32_1 = arith.constant 0 : i32
    return %arg0, %arg1, %c0_i32, %c0_i32_0 : i32, i32, i32, i32
  }
}

module attributes {stable_mosaic.version = 11 : i64} {
  func.func @_conv_s1_kernel(%arg0: i32, %arg1: i32, %arg2: memref<1x16x128xf32, #tpu.memory_space<vmem>>, %arg3: memref<1x1x16x4xf32, #tpu.memory_space<vmem>>, %arg4: memref<1x1x16x3xf32, #tpu.memory_space<vmem>>, %arg5: memref<16x128xf32, #tpu.memory_space<vmem>>, %arg6: memref<16x1xf32, #tpu.memory_space<vmem>>, %arg7: memref<16x1xf32, #tpu.memory_space<vmem>>, %arg8: memref<16x1xf32, #tpu.memory_space<vmem>>, %arg9: memref<1x16x128xf32, #tpu.memory_space<vmem>>, %arg10: memref<1x1x16x1xf32, #tpu.memory_space<vmem>>, %arg11: memref<1x1x16x1xf32, #tpu.memory_space<vmem>>) attributes {dimension_semantics = [#tpu.dimension_semantics<parallel>, #tpu.dimension_semantics<parallel>], iteration_bounds = array<i64: 2, 1>, scalar_prefetch = 0 : i64, scratch_operands = 0 : i64, tpu.core_type = #tpu.core_type<tc>, window_params = [{transform_indices = @transform_0, window_bounds = array<i64: 1, 16, 128>}, {transform_indices = @transform_1, window_bounds = array<i64: 1, 1, 16, 4>}, {transform_indices = @transform_2, window_bounds = array<i64: 1, 1, 16, 3>}, {pipeline_mode = #tpu.pipeline_mode<synchronous>, transform_indices = @transform_3, window_bounds = array<i64: 16, 128>}, {pipeline_mode = #tpu.pipeline_mode<synchronous>, transform_indices = @transform_4, window_bounds = array<i64: 16, 1>}, {pipeline_mode = #tpu.pipeline_mode<synchronous>, transform_indices = @transform_5, window_bounds = array<i64: 16, 1>}, {pipeline_mode = #tpu.pipeline_mode<synchronous>, transform_indices = @transform_6, window_bounds = array<i64: 16, 1>}, {transform_indices = @transform_7, window_bounds = array<i64: 1, 16, 128>}, {transform_indices = @transform_8, window_bounds = array<i64: 1, 1, 16, 1>}, {transform_indices = @transform_9, window_bounds = array<i64: 1, 1, 16, 1>}]} {
    %c0 = arith.constant 0 : index
    %c0_0 = arith.constant 0 : index
    %c0_1 = arith.constant 0 : index
    %c0_2 = arith.constant 0 : index
    %0 = vector.load %arg3[%c0, %c0_0, %c0_1, %c0_2] : memref<1x1x16x4xf32, #tpu.memory_space<vmem>>, vector<1x1x16x4xf32>
    %1 = vector.shape_cast %0 : vector<1x1x16x4xf32> to vector<16x4xf32>
    %c0_3 = arith.constant 0 : index
    %c0_4 = arith.constant 0 : index
    %c0_5 = arith.constant 0 : index
    %2 = vector.load %arg2[%c0_3, %c0_4, %c0_5] : memref<1x16x128xf32, #tpu.memory_space<vmem>>, vector<1x16x128xf32>
    %3 = vector.shape_cast %2 : vector<1x16x128xf32> to vector<16x128xf32>
    %c0_6 = arith.constant 0 : index
    %c0_7 = arith.constant 0 : index
    %c0_8 = arith.constant 0 : index
    %c0_9 = arith.constant 0 : index
    %4 = vector.load %arg4[%c0_6, %c0_7, %c0_8, %c0_9] : memref<1x1x16x3xf32, #tpu.memory_space<vmem>>, vector<1x1x16x3xf32>
    %5 = vector.shape_cast %4 : vector<1x1x16x3xf32> to vector<16x3xf32>
    %6 = tpu.concatenate %1, %3, %5 in 1 : vector<16x4xf32>, vector<16x128xf32>, vector<16x3xf32> -> vector<16x135xf32>
    %c128_i32 = arith.constant 128 : i32
    %7 = arith.muli %arg1, %c128_i32 : i32
    %c4_i32 = arith.constant 4 : i32
    %8 = arith.subi %7, %c4_i32 : i32
    %9 = tpu.iota {dimensions = array<i32: 1>} : vector<1x135xi32>
    %10 = vector.broadcast %8 : i32 to vector<1x135xi32>
    %11 = arith.addi %10, %9 : vector<1x135xi32>
    %c0_i32 = arith.constant 0 : i32
    %12 = vector.broadcast %c0_i32 : i32 to vector<1x135xi32>
    %13 = arith.cmpi sge, %11, %12 : vector<1x135xi32>
    %c17_i32 = arith.constant 17 : i32
    %14 = vector.broadcast %c17_i32 : i32 to vector<1x135xi32>
    %15 = arith.cmpi slt, %11, %14 : vector<1x135xi32>
    %16 = arith.andi %13, %15 : vector<1x135xi1>
    %c0_10 = arith.constant 0 : index
    %c0_11 = arith.constant 0 : index
    %17 = vector.load %arg7[%c0_10, %c0_11] : memref<16x1xf32, #tpu.memory_space<vmem>>, vector<16x1xf32>
    %18 = vector.broadcast %17 : vector<16x1xf32> to vector<16x135xf32>
    %19 = arith.mulf %6, %18 : vector<16x135xf32>
    %c0_12 = arith.constant 0 : index
    %c0_13 = arith.constant 0 : index
    %20 = vector.load %arg8[%c0_12, %c0_13] : memref<16x1xf32, #tpu.memory_space<vmem>>, vector<16x1xf32>
    %21 = vector.broadcast %20 : vector<16x1xf32> to vector<16x135xf32>
    %22 = arith.addf %19, %21 : vector<16x135xf32>
    %cst = arith.constant 0.000000e+00 : f32
    %23 = vector.broadcast %cst : f32 to vector<16x135xf32>
    %24 = arith.cmpf oge, %22, %23 : vector<16x135xf32>
    %cst_14 = arith.constant 2.000000e-01 : f32
    %25 = vector.broadcast %cst_14 : f32 to vector<16x135xf32>
    %26 = arith.mulf %25, %22 : vector<16x135xf32>
    %27 = arith.select %24, %22, %26 : vector<16x135xi1>, vector<16x135xf32>
    %cst_15 = arith.constant 0.000000e+00 : f32
    %28 = vector.broadcast %cst_15 : f32 to vector<16x135xf32>
    %29 = vector.shape_cast %16 : vector<1x135xi1> to vector<1x135xi1>
    %30 = vector.broadcast %29 : vector<1x135xi1> to vector<16x135xi1>
    %31 = arith.select %30, %27, %28 : vector<16x135xi1>, vector<16x135xf32>
    %32 = vector.extract_strided_slice %31 {offsets = [0, 0], sizes = [16, 128], strides = [1, 1]} : vector<16x135xf32> to vector<16x128xf32>
    %33 = vector.extract_strided_slice %31 {offsets = [0, 1], sizes = [16, 128], strides = [1, 1]} : vector<16x135xf32> to vector<16x128xf32>
    %34 = vector.extract_strided_slice %31 {offsets = [0, 2], sizes = [16, 128], strides = [1, 1]} : vector<16x135xf32> to vector<16x128xf32>
    %35 = vector.extract_strided_slice %31 {offsets = [0, 3], sizes = [16, 128], strides = [1, 1]} : vector<16x135xf32> to vector<16x128xf32>
    %36 = vector.extract_strided_slice %31 {offsets = [0, 4], sizes = [16, 128], strides = [1, 1]} : vector<16x135xf32> to vector<16x128xf32>
    %37 = vector.extract_strided_slice %31 {offsets = [0, 5], sizes = [16, 128], strides = [1, 1]} : vector<16x135xf32> to vector<16x128xf32>
    %38 = vector.extract_strided_slice %31 {offsets = [0, 6], sizes = [16, 128], strides = [1, 1]} : vector<16x135xf32> to vector<16x128xf32>
    %39 = vector.extract_strided_slice %31 {offsets = [0, 7], sizes = [16, 128], strides = [1, 1]} : vector<16x135xf32> to vector<16x128xf32>
    %40 = tpu.concatenate %32, %33, %34, %35, %36, %37, %38, %39 in 0 : vector<16x128xf32>, vector<16x128xf32>, vector<16x128xf32>, vector<16x128xf32>, vector<16x128xf32>, vector<16x128xf32>, vector<16x128xf32>, vector<16x128xf32> -> vector<128x128xf32>
    %c0_16 = arith.constant 0 : index
    %c0_17 = arith.constant 0 : index
    %41 = vector.load %arg5[%c0_16, %c0_17] : memref<16x128xf32, #tpu.memory_space<vmem>>, vector<16x128xf32>
    %cst_18 = arith.constant dense<0.000000e+00> : vector<16x128xf32>
    %42 = tpu.matmul %41, %40, %cst_18 {dimension_numbers = #tpu.dot_dimension_numbers<[1], [0], [0], [1], [0, 0, 1, 1], [], []>} : vector<16x128xf32>, vector<128x128xf32>, vector<16x128xf32> -> vector<16x128xf32>
    %c0_19 = arith.constant 0 : index
    %c0_20 = arith.constant 0 : index
    %43 = vector.load %arg6[%c0_19, %c0_20] : memref<16x1xf32, #tpu.memory_space<vmem>>, vector<16x1xf32>
    %44 = vector.broadcast %43 : vector<16x1xf32> to vector<16x128xf32>
    %45 = arith.addf %42, %44 : vector<16x128xf32>
    %c0_21 = arith.constant 0 : index
    %c0_22 = arith.constant 0 : index
    %c0_23 = arith.constant 0 : index
    %46 = vector.load %arg9[%c0_21, %c0_22, %c0_23] : memref<1x16x128xf32, #tpu.memory_space<vmem>>, vector<1x16x128xf32>
    %47 = vector.shape_cast %46 : vector<1x16x128xf32> to vector<16x128xf32>
    %48 = vector.shape_cast %45 : vector<16x128xf32> to vector<1x16x128xf32>
    tpu.vector_store %arg9[%c0_21, %c0_22, %c0_23], %48 {strides = array<i32>} : memref<1x16x128xf32, #tpu.memory_space<vmem>>, vector<1x16x128xf32>,
    %c128_i32_24 = arith.constant 128 : i32
    %49 = arith.muli %arg1, %c128_i32_24 : i32
    %50 = tpu.iota {dimensions = array<i32: 1>} : vector<1x128xi32>
    %51 = vector.broadcast %49 : i32 to vector<1x128xi32>
    %52 = arith.addi %51, %50 : vector<1x128xi32>
    %c18_i32 = arith.constant 18 : i32
    %53 = vector.broadcast %c18_i32 : i32 to vector<1x128xi32>
    %54 = arith.cmpi slt, %52, %53 : vector<1x128xi32>
    %55 = arith.extui %54 : vector<1x128xi1> to vector<1x128xi32>
    %56 = arith.sitofp %55 : vector<1x128xi32> to vector<1x128xf32>
    %57 = vector.broadcast %56 : vector<1x128xf32> to vector<16x128xf32>
    %58 = arith.mulf %45, %57 : vector<16x128xf32>
    %cst_25 = arith.constant dense<0.000000e+00> : vector<16xf32>
    %59 = vector.multi_reduction <add>, %58, %cst_25 [1] : vector<16x128xf32> to vector<16xf32>
    %60 = vector.shape_cast %59 : vector<16xf32> to vector<16x1xf32>
    %c0_26 = arith.constant 0 : index
    %c0_27 = arith.constant 0 : index
    %c0_28 = arith.constant 0 : index
    %c0_29 = arith.constant 0 : index
    %61 = vector.load %arg10[%c0_26, %c0_27, %c0_28, %c0_29] : memref<1x1x16x1xf32, #tpu.memory_space<vmem>>, vector<1x1x16x1xf32>
    %62 = vector.shape_cast %61 : vector<1x1x16x1xf32> to vector<16x1xf32>
    %63 = vector.shape_cast %60 : vector<16x1xf32> to vector<1x1x16x1xf32>
    tpu.vector_store %arg10[%c0_26, %c0_27, %c0_28, %c0_29], %63 {strides = array<i32>} : memref<1x1x16x1xf32, #tpu.memory_space<vmem>>, vector<1x1x16x1xf32>,
    %64 = arith.mulf %58, %58 : vector<16x128xf32>
    %cst_30 = arith.constant dense<0.000000e+00> : vector<16xf32>
    %65 = vector.multi_reduction <add>, %64, %cst_30 [1] : vector<16x128xf32> to vector<16xf32>
    %66 = vector.shape_cast %65 : vector<16xf32> to vector<16x1xf32>
    %c0_31 = arith.constant 0 : index
    %c0_32 = arith.constant 0 : index
    %c0_33 = arith.constant 0 : index
    %c0_34 = arith.constant 0 : index
    %67 = vector.load %arg11[%c0_31, %c0_32, %c0_33, %c0_34] : memref<1x1x16x1xf32, #tpu.memory_space<vmem>>, vector<1x1x16x1xf32>
    %68 = vector.shape_cast %67 : vector<1x1x16x1xf32> to vector<16x1xf32>
    %69 = vector.shape_cast %66 : vector<16x1xf32> to vector<1x1x16x1xf32>
    tpu.vector_store %arg11[%c0_31, %c0_32, %c0_33, %c0_34], %69 {strides = array<i32>} : memref<1x1x16x1xf32, #tpu.memory_space<vmem>>, vector<1x1x16x1xf32>,
    return
  }
  func.func @transform_0(%arg0: i32, %arg1: i32) -> (i32, i32, i32) {
    %c0_i32 = arith.constant 0 : i32
    %c0_i32_0 = arith.constant 0 : i32
    return %arg0, %c0_i32, %arg1 : i32, i32, i32
  }
  func.func @transform_1(%arg0: i32, %arg1: i32) -> (i32, i32, i32, i32) {
    %c0_i32 = arith.constant 0 : i32
    %c0_i32_0 = arith.constant 0 : i32
    %c0_i32_1 = arith.constant 0 : i32
    return %arg0, %arg1, %c0_i32, %c0_i32_0 : i32, i32, i32, i32
  }
  func.func @transform_2(%arg0: i32, %arg1: i32) -> (i32, i32, i32, i32) {
    %c0_i32 = arith.constant 0 : i32
    %c0_i32_0 = arith.constant 0 : i32
    %c0_i32_1 = arith.constant 0 : i32
    return %arg0, %arg1, %c0_i32, %c0_i32_0 : i32, i32, i32, i32
  }
  func.func @transform_3(%arg0: i32, %arg1: i32) -> (i32, i32) {
    %c0_i32 = arith.constant 0 : i32
    %c0_i32_0 = arith.constant 0 : i32
    %c0_i32_1 = arith.constant 0 : i32
    return %c0_i32, %c0_i32_0 : i32, i32
  }
  func.func @transform_4(%arg0: i32, %arg1: i32) -> (i32, i32) {
    %c0_i32 = arith.constant 0 : i32
    %c0_i32_0 = arith.constant 0 : i32
    %c0_i32_1 = arith.constant 0 : i32
    return %c0_i32, %c0_i32_0 : i32, i32
  }
  func.func @transform_5(%arg0: i32, %arg1: i32) -> (i32, i32) {
    %c0_i32 = arith.constant 0 : i32
    %c0_i32_0 = arith.constant 0 : i32
    %c0_i32_1 = arith.constant 0 : i32
    return %c0_i32, %c0_i32_0 : i32, i32
  }
  func.func @transform_6(%arg0: i32, %arg1: i32) -> (i32, i32) {
    %c0_i32 = arith.constant 0 : i32
    %c0_i32_0 = arith.constant 0 : i32
    %c0_i32_1 = arith.constant 0 : i32
    return %c0_i32, %c0_i32_0 : i32, i32
  }
  func.func @transform_7(%arg0: i32, %arg1: i32) -> (i32, i32, i32) {
    %c0_i32 = arith.constant 0 : i32
    %c0_i32_0 = arith.constant 0 : i32
    return %arg0, %c0_i32, %arg1 : i32, i32, i32
  }
  func.func @transform_8(%arg0: i32, %arg1: i32) -> (i32, i32, i32, i32) {
    %c0_i32 = arith.constant 0 : i32
    %c0_i32_0 = arith.constant 0 : i32
    %c0_i32_1 = arith.constant 0 : i32
    return %arg0, %arg1, %c0_i32, %c0_i32_0 : i32, i32, i32, i32
  }
  func.func @transform_9(%arg0: i32, %arg1: i32) -> (i32, i32, i32, i32) {
    %c0_i32 = arith.constant 0 : i32
    %c0_i32_0 = arith.constant 0 : i32
    %c0_i32_1 = arith.constant 0 : i32
    return %arg0, %arg1, %c0_i32, %c0_i32_0 : i32, i32, i32, i32
  }
}

module attributes {stable_mosaic.version = 11 : i64} {
  func.func @_conv_s1_kernel(%arg0: i32, %arg1: i32, %arg2: memref<1x16x128xf32, #tpu.memory_space<vmem>>, %arg3: memref<1x1x16x1xf32, #tpu.memory_space<vmem>>, %arg4: memref<1x1x16x1xf32, #tpu.memory_space<vmem>>, %arg5: memref<1x48xf32, #tpu.memory_space<vmem>>, %arg6: memref<1x1xf32, #tpu.memory_space<vmem>>, %arg7: memref<16x1xf32, #tpu.memory_space<vmem>>, %arg8: memref<16x1xf32, #tpu.memory_space<vmem>>, %arg9: memref<1x1x128xf32, #tpu.memory_space<vmem>>) attributes {dimension_semantics = [#tpu.dimension_semantics<parallel>, #tpu.dimension_semantics<parallel>], iteration_bounds = array<i64: 2, 1>, scalar_prefetch = 0 : i64, scratch_operands = 0 : i64, tpu.core_type = #tpu.core_type<tc>, window_params = [{transform_indices = @transform_0, window_bounds = array<i64: 1, 16, 128>}, {transform_indices = @transform_1, window_bounds = array<i64: 1, 1, 16, 1>}, {transform_indices = @transform_2, window_bounds = array<i64: 1, 1, 16, 1>}, {pipeline_mode = #tpu.pipeline_mode<synchronous>, transform_indices = @transform_3, window_bounds = array<i64: 1, 48>}, {pipeline_mode = #tpu.pipeline_mode<synchronous>, transform_indices = @transform_4, window_bounds = array<i64: 1, 1>}, {pipeline_mode = #tpu.pipeline_mode<synchronous>, transform_indices = @transform_5, window_bounds = array<i64: 16, 1>}, {pipeline_mode = #tpu.pipeline_mode<synchronous>, transform_indices = @transform_6, window_bounds = array<i64: 16, 1>}, {transform_indices = @transform_7, window_bounds = array<i64: 1, 1, 128>}]} {
    %c0 = arith.constant 0 : index
    %c0_0 = arith.constant 0 : index
    %c0_1 = arith.constant 0 : index
    %c0_2 = arith.constant 0 : index
    %0 = vector.load %arg3[%c0, %c0_0, %c0_1, %c0_2] : memref<1x1x16x1xf32, #tpu.memory_space<vmem>>, vector<1x1x16x1xf32>
    %1 = vector.shape_cast %0 : vector<1x1x16x1xf32> to vector<16x1xf32>
    %c0_3 = arith.constant 0 : index
    %c0_4 = arith.constant 0 : index
    %c0_5 = arith.constant 0 : index
    %2 = vector.load %arg2[%c0_3, %c0_4, %c0_5] : memref<1x16x128xf32, #tpu.memory_space<vmem>>, vector<1x16x128xf32>
    %3 = vector.shape_cast %2 : vector<1x16x128xf32> to vector<16x128xf32>
    %c0_6 = arith.constant 0 : index
    %c0_7 = arith.constant 0 : index
    %c0_8 = arith.constant 0 : index
    %c0_9 = arith.constant 0 : index
    %4 = vector.load %arg4[%c0_6, %c0_7, %c0_8, %c0_9] : memref<1x1x16x1xf32, #tpu.memory_space<vmem>>, vector<1x1x16x1xf32>
    %5 = vector.shape_cast %4 : vector<1x1x16x1xf32> to vector<16x1xf32>
    %6 = tpu.concatenate %1, %3, %5 in 1 : vector<16x1xf32>, vector<16x128xf32>, vector<16x1xf32> -> vector<16x130xf32>
    %c128_i32 = arith.constant 128 : i32
    %7 = arith.muli %arg1, %c128_i32 : i32
    %c1_i32 = arith.constant 1 : i32
    %8 = arith.subi %7, %c1_i32 : i32
    %9 = tpu.iota {dimensions = array<i32: 1>} : vector<1x130xi32>
    %10 = vector.broadcast %8 : i32 to vector<1x130xi32>
    %11 = arith.addi %10, %9 : vector<1x130xi32>
    %c0_i32 = arith.constant 0 : i32
    %12 = vector.broadcast %c0_i32 : i32 to vector<1x130xi32>
    %13 = arith.cmpi sge, %11, %12 : vector<1x130xi32>
    %c19_i32 = arith.constant 19 : i32
    %14 = vector.broadcast %c19_i32 : i32 to vector<1x130xi32>
    %15 = arith.cmpi slt, %11, %14 : vector<1x130xi32>
    %16 = arith.andi %13, %15 : vector<1x130xi1>
    %c0_10 = arith.constant 0 : index
    %c0_11 = arith.constant 0 : index
    %17 = vector.load %arg7[%c0_10, %c0_11] : memref<16x1xf32, #tpu.memory_space<vmem>>, vector<16x1xf32>
    %18 = vector.broadcast %17 : vector<16x1xf32> to vector<16x130xf32>
    %19 = arith.mulf %6, %18 : vector<16x130xf32>
    %c0_12 = arith.constant 0 : index
    %c0_13 = arith.constant 0 : index
    %20 = vector.load %arg8[%c0_12, %c0_13] : memref<16x1xf32, #tpu.memory_space<vmem>>, vector<16x1xf32>
    %21 = vector.broadcast %20 : vector<16x1xf32> to vector<16x130xf32>
    %22 = arith.addf %19, %21 : vector<16x130xf32>
    %cst = arith.constant 0.000000e+00 : f32
    %23 = vector.broadcast %cst : f32 to vector<16x130xf32>
    %24 = arith.cmpf oge, %22, %23 : vector<16x130xf32>
    %cst_14 = arith.constant 2.000000e-01 : f32
    %25 = vector.broadcast %cst_14 : f32 to vector<16x130xf32>
    %26 = arith.mulf %25, %22 : vector<16x130xf32>
    %27 = arith.select %24, %22, %26 : vector<16x130xi1>, vector<16x130xf32>
    %cst_15 = arith.constant 0.000000e+00 : f32
    %28 = vector.broadcast %cst_15 : f32 to vector<16x130xf32>
    %29 = vector.shape_cast %16 : vector<1x130xi1> to vector<1x130xi1>
    %30 = vector.broadcast %29 : vector<1x130xi1> to vector<16x130xi1>
    %31 = arith.select %30, %27, %28 : vector<16x130xi1>, vector<16x130xf32>
    %32 = vector.extract_strided_slice %31 {offsets = [0, 0], sizes = [16, 128], strides = [1, 1]} : vector<16x130xf32> to vector<16x128xf32>
    %33 = vector.extract_strided_slice %31 {offsets = [0, 1], sizes = [16, 128], strides = [1, 1]} : vector<16x130xf32> to vector<16x128xf32>
    %34 = vector.extract_strided_slice %31 {offsets = [0, 2], sizes = [16, 128], strides = [1, 1]} : vector<16x130xf32> to vector<16x128xf32>
    %35 = tpu.concatenate %32, %33, %34 in 0 : vector<16x128xf32>, vector<16x128xf32>, vector<16x128xf32> -> vector<48x128xf32>
    %c0_16 = arith.constant 0 : index
    %c0_17 = arith.constant 0 : index
    %36 = vector.load %arg5[%c0_16, %c0_17] : memref<1x48xf32, #tpu.memory_space<vmem>>, vector<1x48xf32>
    %cst_18 = arith.constant dense<0.000000e+00> : vector<1x128xf32>
    %37 = tpu.matmul %36, %35, %cst_18 {dimension_numbers = #tpu.dot_dimension_numbers<[1], [0], [0], [1], [0, 0, 1, 1], [], []>} : vector<1x48xf32>, vector<48x128xf32>, vector<1x128xf32> -> vector<1x128xf32>
    %c0_19 = arith.constant 0 : index
    %c0_20 = arith.constant 0 : index
    %38 = vector.load %arg6[%c0_19, %c0_20] : memref<1x1xf32, #tpu.memory_space<vmem>>, vector<1x1xf32>
    %39 = vector.broadcast %38 : vector<1x1xf32> to vector<1x128xf32>
    %40 = arith.addf %37, %39 : vector<1x128xf32>
    %c0_21 = arith.constant 0 : index
    %c0_22 = arith.constant 0 : index
    %c0_23 = arith.constant 0 : index
    %41 = vector.load %arg9[%c0_21, %c0_22, %c0_23] : memref<1x1x128xf32, #tpu.memory_space<vmem>>, vector<1x1x128xf32>
    %42 = vector.shape_cast %41 : vector<1x1x128xf32> to vector<1x128xf32>
    %43 = vector.shape_cast %40 : vector<1x128xf32> to vector<1x1x128xf32>
    tpu.vector_store %arg9[%c0_21, %c0_22, %c0_23], %43 {strides = array<i32>} : memref<1x1x128xf32, #tpu.memory_space<vmem>>, vector<1x1x128xf32>,
    return
  }
  func.func @transform_0(%arg0: i32, %arg1: i32) -> (i32, i32, i32) {
    %c0_i32 = arith.constant 0 : i32
    %c0_i32_0 = arith.constant 0 : i32
    return %arg0, %c0_i32, %arg1 : i32, i32, i32
  }
  func.func @transform_1(%arg0: i32, %arg1: i32) -> (i32, i32, i32, i32) {
    %c0_i32 = arith.constant 0 : i32
    %c0_i32_0 = arith.constant 0 : i32
    %c0_i32_1 = arith.constant 0 : i32
    return %arg0, %arg1, %c0_i32, %c0_i32_0 : i32, i32, i32, i32
  }
  func.func @transform_2(%arg0: i32, %arg1: i32) -> (i32, i32, i32, i32) {
    %c0_i32 = arith.constant 0 : i32
    %c0_i32_0 = arith.constant 0 : i32
    %c0_i32_1 = arith.constant 0 : i32
    return %arg0, %arg1, %c0_i32, %c0_i32_0 : i32, i32, i32, i32
  }
  func.func @transform_3(%arg0: i32, %arg1: i32) -> (i32, i32) {
    %c0_i32 = arith.constant 0 : i32
    %c0_i32_0 = arith.constant 0 : i32
    %c0_i32_1 = arith.constant 0 : i32
    return %c0_i32, %c0_i32_0 : i32, i32
  }
  func.func @transform_4(%arg0: i32, %arg1: i32) -> (i32, i32) {
    %c0_i32 = arith.constant 0 : i32
    %c0_i32_0 = arith.constant 0 : i32
    %c0_i32_1 = arith.constant 0 : i32
    return %c0_i32, %c0_i32_0 : i32, i32
  }
  func.func @transform_5(%arg0: i32, %arg1: i32) -> (i32, i32) {
    %c0_i32 = arith.constant 0 : i32
    %c0_i32_0 = arith.constant 0 : i32
    %c0_i32_1 = arith.constant 0 : i32
    return %c0_i32, %c0_i32_0 : i32, i32
  }
  func.func @transform_6(%arg0: i32, %arg1: i32) -> (i32, i32) {
    %c0_i32 = arith.constant 0 : i32
    %c0_i32_0 = arith.constant 0 : i32
    %c0_i32_1 = arith.constant 0 : i32
    return %c0_i32, %c0_i32_0 : i32, i32
  }
  func.func @transform_7(%arg0: i32, %arg1: i32) -> (i32, i32, i32) {
    %c0_i32 = arith.constant 0 : i32
    %c0_i32_0 = arith.constant 0 : i32
    return %arg0, %c0_i32, %arg1 : i32, i32, i32
  }
}

</mosaic_0001>

<bundles_post_ra>
// kernel: mul_layer_discriminator_forward.7
= control target key start
LH: loop header
LB: loop body
LE: loop exit
PB: predicated region body
PF: predicated region fallthrough
CT: control target
= control target key end

     0   :  { %s502_s12 = smov 0   ;;  %s504_s13 = smov 0   ;;  %s545_s0 = inlined_call_operand.vmem [shape: f32[2,1,54,128], index: 0, kind: input, shape index: {}]   ;;  %s546_s1 = inlined_call_operand.vmem [shape: f32[8,54], index: 1, kind: input, shape index: {}]   ;;  %s547_s2 = inlined_call_operand.vmem [shape: f32[8,1], index: 2, kind: input, shape index: {}]   ;;  %s548_s3 = inlined_call_operand.vmem [shape: f32[2,8,128], index: 3, kind: output, shape index: {}]  }
   0x1   :  { %s506_s14 = smov 0  }
   0x2 LB: > { %s25_s15 = sadd.s32 1, %s472_s13  ;;  %p383_p0 = scmp.ge.s32.totalorder %s476_s14, 1  ;;  %s476_s14 = sphi %s506_s14, %s13_s14   ;;  %s472_s13 = sphi %s504_s13, %s550_s13   ;;  %s468_s12 = sphi %s502_s12, %s549_s12  }
   0x3   : > { %p27_p1 = scmp.ge.s32.totalorder %s25_s15, 2  ;;  %p157_p2 = scmp.lt.s32.totalorder %s476_s14, 3 }
   0x5   : > { %s552_s15 = smov (%p27_p1, %s25_s15), 0  ;;  %p158_p3 = pnand %p383_p0, %p157_p2 }
   0x6   : > { %p187_p4 = scmp.lt.s32.totalorder (!%p158_p3), %s468_s12, 1  ;;  %v478_v0 = vmov (!%p158_p3), 0.0|0.0   ;;  %vm479_vm0 = vmmov (!%p158_p3), 0   ;;  %v480_v1 = vmov (!%p158_p3), 0.0   ;;  %v211_v2 = vld [vmem:[%s547_s2] sm:$0xff] (!%p158_p3)  ;;  %v481_v3 = vmov (!%p158_p3), 0  }
   0x7   : > { %161 = sbr.rel (%p158_p3) target bundleno = 252 (0xfc), region = 32  ;;  %415 = vmatprep.subr.bf16.mxu0 (!%p158_p3), %v478_v0  ;;  %412 = vmatprep.mubr.msk.f32.mxu0 (!%p158_p3), %vm479_vm0, %v480_v1  ;;  %vm221_vm1 = vcmask (!%p158_p3), 1045504   ;;  %v203_v14 = vld [vmem:[%s546_s1] sm:$0xff] (!%p158_p3)  ;;  %vm217_vm2 = vcmask (!%p158_p3), 441344  }
   0x8   : > { %453 = vset.pattern.permute.xlu0 (!%p158_p3), %v481_v3 }
   0x9   : > { %214 = vperm.xlu0 (!%p158_p3), %453, %v211_v2  }
   0xe   : > { %s554_s12 = smov (!%p187_p4, %s468_s12), 1 }
   0xf   : > { %s424_s18 = smul.u32 56, %s554_s12  ;;  %s385_s24 = sshll.u32 %s554_s12, 3 }
  0x10   : > { %s202_s27 = scalar_lea.vmem %s548_s3, %s385_s24 }
  0x11   : > { %s195_s21 = scalar_lea.vmem %s545_s0, %s424_s18 }
  0x12   : > { %v204_v4 = vld [vmem:[%s195_s21] sm:$0xff]  ;;  %v205_v5 = vld [vmem:[%s195_s21 + $0x8] sm:$0xff]  ;;  %v206_v6 = vld [vmem:[%s195_s21 + $0x10] sm:$0xff] }
  0x13   : > { %v416_v7 = vpack.c.bf16 %v205_v5, %v204_v4  ;;  %v207_v8 = vld [vmem:[%s195_s21 + $0x18] sm:$0xff]  ;;  %v208_v10 = vld [vmem:[%s195_s21 + $0x20] sm:$0xff]  ;;  %v209_v11 = vld [vmem:[%s195_s21 + $0x28] sm:$0xff] }
  0x14   : > { %v419_v9 = vpack.c.bf16 %v207_v8, %v206_v6  ;;  %v422_v12 = vpack.c.bf16 %v209_v11, %v208_v10  ;;  %v210_v13 = vld [vmem:[%s195_s21 + $0x30] sm:$0x3f] }
  0x15   : > { %417 = vmatpush3.bf16.msra.mxu0 %v416_v7 }
  0x16   : > { %418 = vmatprep.subr.bf16.mxu0 %v478_v0 }
  0x19   : > { %420 = vmatpush3.bf16.msra.mxu0 %v419_v9 }
  0x1a   : > { %421 = vmatprep.subr.bf16.mxu0 %v478_v0 }
  0x1d   : > { %423 = vmatpush3.bf16.msra.mxu0 %v422_v12 }
  0x1e   : > { %410 = vmatprep.subr.mxu0 %v480_v1 }
  0x21   : > { %411 = vmatpush3.msk.msra.mxu0 %vm221_vm1, %v210_v13 }
  0x22   : > { %413 = vmatmul.mubr.msk.f32.vlgmr.msra.gmra.mrb[0].mxu0 %vm217_vm2, %v203_v14 }
  0x88   : > { %v215_v15 = vpop.permute.xlu0 %214 }
  0xf5   : > { %v291_v16 = vpop.f32.mrb[0].mxu0 }
  0xf6   : > { %v292_v17 = vadd.f32 %v291_v16, %v215_v15  ;;  %v414_v18 = vpop.f32.mrb[1].mxu0 }
  0xf8   : > { %vm295_vm3 = vcmp.ge.f32.partialorder %v292_v17, 0.0  ;;  %v296_v19 = vmul.f32 0.2, %v292_v17 }
  0xfa   : > { %v297_v20 = vsel %vm295_vm3, %v292_v17, %v296_v19 }
  0xfb   : > { %298 = vst [vmem:[%s202_s27] sm:$0xff] %v297_v20 }
  0xfc PF: > { %s13_s14 = sadd.s32 1, %s476_s14   ;;  %s549_s12 = smov %s472_s13 }
  0xfd   : > { %p10_p5 = scmp.ge.s32.totalorder %s13_s14, 4   ;;  %s550_s13 = smov %s552_s15 }
  0xff   :  { %12 = sbr.rel (!%p10_p5) target bundleno = 2 (0x2), region = 62 }

// kernel: mul_layer_discriminator_forward.6
= control target key start
LH: loop header
LB: loop body
LE: loop exit
PB: predicated region body
PF: predicated region fallthrough
CT: control target
= control target key end

     0   :  { %s838_s24 = smov 0   ;;  %s840_s25 = smov 0   ;;  %s896_s0 = inlined_call_operand.vmem [shape: f32[2,4,128], index: 0, kind: input, shape index: {}]   ;;  %s897_s1 = inlined_call_operand.vmem [shape: f32[2,1,4,4], index: 1, kind: input, shape index: {}, may-alias: {1,2}]   ;;  %s898_s2 = inlined_call_operand.vmem [shape: f32[2,1,4,4], index: 2, kind: input, shape index: {}, may-alias: {1,2}]   ;;  %s899_s3 = inlined_call_operand.vmem [shape: f32[8,36], index: 3, kind: input, shape index: {}]   ;;  %s900_s4 = inlined_call_operand.vmem [shape: f32[8,1], index: 4, kind: input, shape index: {}]   ;;  %s901_s5 = inlined_call_operand.vmem [shape: f32[4,1], index: 5, kind: input, shape index: {}]   ;;  %s902_s6 = inlined_call_operand.vmem [shape: f32[4,1], index: 6, kind: input, shape index: {}]   ;;  %s903_s7 = inlined_call_operand.vmem [shape: f32[2,8,128], index: 7, kind: output, shape index: {}]  }
   0x1   :  { %s842_s2 = smov 0  }
   0x2 LB: > { %s29_s5 = sadd.s32 1, %s779_s25  ;;  %p654_p0 = scmp.ge.s32.totalorder %s783_s2, 1  ;;  %s783_s2 = sphi %s842_s2, %s17_s2   ;;  %s779_s25 = sphi %s840_s25, %s905_s25   ;;  %s775_s24 = sphi %s838_s24, %s904_s24  }
   0x3   : > { %p31_p1 = scmp.ge.s32.totalorder %s29_s5, 2  ;;  %p283_p2 = scmp.lt.s32.totalorder %s783_s2, 3 }
   0x5   : > { %s907_s5 = smov (%p31_p1, %s29_s5), 0  ;;  %p284_p3 = pnand %p654_p0, %p283_p2 }
   0x6   : > { %p333_p4 = scmp.lt.s32.totalorder (!%p284_p3), %s775_s24, 1  ;;  %s785_s29 = smov (!%p284_p3), 4   ;;  %v377_v1 = vlaneseq (!%p284_p3)  ;;  %vm372_vm2 = vcmask (!%p284_p3), 31744   ;;  %v786_v8 = vmov (!%p284_p3), 0.0|0.0   ;;  %v787_v10 = vmov (!%p284_p3), 0.0   ;;  %v460_v15 = vld [vmem:[%s900_s4] sm:$0xff] (!%p284_p3) }
   0x7   : > { %287 = sbr.rel (%p284_p3) target bundleno = 493 (0x1ed), region = 48  ;;  %682 = vmatprep.subr.bf16.mxu0 (!%p284_p3), %v786_v8  ;;  %v398_v12 = vrot.slane (!%p284_p3), %v787_v10, 4  ;;  %s788_s10 = smov (!%p284_p3), 124   ;;  %vm794_vm4 = vmmov (!%p284_p3), 0   ;;  %v795_v14 = vmov (!%p284_p3), 0   ;;  %vm403_vm5 = vcmask (!%p284_p3), 1039360  }
   0x8   : > { %v378_v2 = vand.u32 (!%p284_p3), 127, %v377_v1  ;;  %s789_s11 = smov (!%p284_p3), 126   ;;  %s790_s12 = smov (!%p284_p3), 125   ;;  %679 = vmatprep.mubr.msk.f32.mxu0 (!%p284_p3), %vm794_vm4, %v787_v10  ;;  %760 = vset.pattern.permute.xlu0 (!%p284_p3), %v795_v14  ;;  %vm410_vm6 = vcmask (!%p284_p3), 1031168   ;;  %vm417_vm7 = vcmask (!%p284_p3), 1022976   ;;  %vm454_vm8 = vcmask (!%p284_p3), 1043456  }
   0x9   : > { %s791_s13 = smov (!%p284_p3), 127   ;;  %s792_s14 = smov (!%p284_p3), 123   ;;  %vm431_vm9 = vcmask (!%p284_p3), 1006592   ;;  %vm424_vm10 = vcmask (!%p284_p3), 1014784   ;;  %vm438_vm11 = vcmask (!%p284_p3), 998400   ;;  %vm445_vm12 = vcmask (!%p284_p3), 990208  }
   0xa   : > { %v381_v3 = vadd.s32 (!%p284_p3), 4294967292, %v378_v2  ;;  %s793_s15 = smov (!%p284_p3), 122   ;;  %s796_s16 = smov (!%p284_p3), 121   ;;  %vm452_vm13 = vcmask (!%p284_p3), 982016   ;;  %v459_v52 = vld [vmem:[%s899_s3] sm:$0xff] (!%p284_p3)  ;;  %vm466_vm14 = vcmask (!%p284_p3), 293888  }
   0xb   : > { %s797_s17 = smov (!%p284_p3), 120  }
   0xc   : > { %vm383_vm0 = vcmp.ge.s32.totalorder (!%p284_p3), %v381_v3, 0  ;;  %vm385_vm1 = vcmp.lt.s32.totalorder (!%p284_p3), %v381_v3, 16 }
   0xd   : > { %vm387_vm3 = vmand (!%p284_p3), %vm383_vm0, %vm385_vm1 }
   0xe   : > { %s909_s24 = smov (!%p333_p4, %s775_s24), 1 }
   0xf   : > { %s655_s6 = sshll.u32 %s909_s24, 2  ;;  %s658_s22 = sshll.u32 %s909_s24, 3 }
  0x10   : > { %s339_s28 = scalar_lea.vmem %s896_s0, %s655_s6  ;;  %s346_s9 = scalar_lea.vmem %s897_s1, %s655_s6 }
  0x11   : > { %v362_v0 = vld [vmem:[%s339_s28] sm:$0xf]  ;;  %s360_s26 = scalar_lea.vmem %s903_s7, %s658_s22 }
  0x12   : > { %365 = vrot.lane.b32.xlu0 %v362_v0, %s785_s29  ;;  %v361_v4 = vld [vmem:[%s346_s9] sm:$0xf] }
  0x84   : > { %v366_v5 = vpop.permute.xlu0 %365 }
  0x85   : > { %v373_v6 = vsel %vm372_vm2, %v361_v4, %v366_v5 }
  0x86   : > { %v393_v7 = vsel %vm387_vm3, %v373_v6, 0.0 }
  0x87   : > { %v397_v9 = vrot.slane %v393_v7, 4  ;;  %v730_v11 = vpack.i.bf16 %v787_v10, %v393_v7 }
  0x89   : > { %731 = vrot.lane.b32.xlu0 %v730_v11, %s788_s10  ;;  %726 = vrot.lane.b32.xlu1 %v730_v11, %s789_s11  ;;  %v745_v13 = vpack.i.bf16 %v398_v12, %v397_v9 }
  0x8d   : > { %746 = vrot.lane.b32.xlu1 %v745_v13, %s790_s12  ;;  %736 = vrot.lane.b32.xlu0 %v745_v13, %s791_s13 }
  0x91   : > { %751 = vrot.lane.b32.xlu1 %v745_v13, %s792_s14  ;;  %741 = vrot.lane.b32.xlu0 %v730_v11, %s793_s15 }
  0x95   : > { %756 = vrot.lane.b32.xlu1 %v745_v13, %s796_s16  ;;  %448 = vrot.lane.b32.xlu0 %v393_v7, %s797_s17 }
  0x99   : > { %450 = vrot.lane.b32.xlu1 %v787_v10, %s797_s17  ;;  %463 = vperm.xlu0 %760, %v460_v15  }
  0xfb   : > { %v732_v16 = vpop.permute.xlu0 %731  ;;  %v727_v17 = vpop.permute.xlu1 %726 }
  0xfc   : > { %v729_v18 = vunpack.i.h.bf16 %v727_v17  ;;  %v728_v19 = vunpack.i.l.bf16 %v727_v17  ;;  %v734_v36 = vunpack.i.h.bf16 %v732_v16  ;;  %v733_v37 = vunpack.i.l.bf16 %v732_v16 }
  0xfe   : > { %v411_v27 = vsel %vm410_vm6, %v728_v19, %v729_v18  ;;  %v425_v44 = vsel %vm424_vm10, %v733_v37, %v734_v36 }
  0xff   : > { %v747_v20 = vpop.permute.xlu1 %746  ;;  %v737_v21 = vpop.permute.xlu0 %736 }
 0x100   : > { %v749_v22 = vunpack.i.h.bf16 %v747_v20  ;;  %v748_v23 = vunpack.i.l.bf16 %v747_v20  ;;  %v739_v24 = vunpack.i.h.bf16 %v737_v21  ;;  %v738_v25 = vunpack.i.l.bf16 %v737_v21 }
 0x102   : > { %v404_v26 = vsel %vm403_vm5, %v738_v25, %v739_v24  ;;  %v418_v28 = vsel %vm417_vm7, %v748_v23, %v749_v22 }
 0x103   : > { %v752_v29 = vpop.permute.xlu1 %751  ;;  %v742_v30 = vpop.permute.xlu0 %741  ;;  %v455_v31 = vsel %vm454_vm8, %v393_v7, %v404_v26  ;;  %v456_v32 = vsel %vm454_vm8, %v411_v27, %v418_v28 }
 0x104   : > { %v754_v33 = vunpack.i.h.bf16 %v752_v29  ;;  %v753_v34 = vunpack.i.l.bf16 %v752_v29  ;;  %v683_v35 = vpack.c.bf16 %v456_v32, %v455_v31  ;;  %v744_v38 = vunpack.i.h.bf16 %v742_v30 }
 0x105   : > { %v743_v39 = vunpack.i.l.bf16 %v742_v30 }
 0x106   : > { %684 = vmatpush3.bf16.msra.mxu0 %v683_v35  ;;  %v432_v41 = vsel %vm431_vm9, %v753_v34, %v754_v33 }
 0x107   : > { %v757_v40 = vpop.permute.xlu1 %756  ;;  %685 = vmatprep.subr.bf16.mxu0 %v786_v8  ;;  %v439_v45 = vsel %vm438_vm11, %v743_v39, %v744_v38  ;;  %v457_v47 = vsel %vm454_vm8, %v425_v44, %v432_v41  ;;  %v449_v51 = vpop.permute.xlu0 %448 }
 0x108   : > { %v759_v42 = vunpack.i.h.bf16 %v757_v40  ;;  %v758_v43 = vunpack.i.l.bf16 %v757_v40 }
 0x10a   : > { %v446_v46 = vsel %vm445_vm12, %v758_v43, %v759_v42 }
 0x10b   : > { %v458_v48 = vsel %vm454_vm8, %v439_v45, %v446_v46  ;;  %v451_v50 = vpop.permute.xlu1 %450 }
 0x10c   : > { %v686_v49 = vpack.c.bf16 %v458_v48, %v457_v47  ;;  %v453_v53 = vsel %vm452_vm13, %v449_v51, %v451_v50 }
 0x10e   : > { %687 = vmatpush3.bf16.msra.mxu0 %v686_v49 }
 0x10f   : > { %677 = vmatprep.subr.mxu0 %v787_v10 }
 0x112   : > { %678 = vmatpush3.msk.msra.mxu0 %vm454_vm8, %v453_v53 }
 0x113   : > { %680 = vmatmul.mubr.msk.f32.vlgmr.msra.gmra.mrb[0].mxu0 %vm466_vm14, %v459_v52 }
 0x118   : > { %v464_v54 = vpop.permute.xlu0 %463 }
 0x1e6   : > { %v538_v55 = vpop.f32.mrb[0].mxu0 }
 0x1e7   : > { %v539_v56 = vadd.f32 %v538_v55, %v464_v54  ;;  %v681_v57 = vpop.f32.mrb[1].mxu0 }
 0x1e9   : > { %vm542_vm15 = vcmp.ge.f32.partialorder %v539_v56, 0.0  ;;  %v543_v58 = vmul.f32 0.2, %v539_v56 }
 0x1eb   : > { %v544_v59 = vsel %vm542_vm15, %v539_v56, %v543_v58 }
 0x1ec   : > { %545 = vst [vmem:[%s360_s26] sm:$0xff] %v544_v59 }
 0x1ed PF: > { %s17_s2 = sadd.s32 1, %s783_s2   ;;  %s904_s24 = smov %s779_s25 }
 0x1ee   : > { %p14_p5 = scmp.ge.s32.totalorder %s17_s2, 4   ;;  %s905_s25 = smov %s907_s5 }
 0x1f0   :  { %16 = sbr.rel (!%p14_p5) target bundleno = 2 (0x2), region = 84 }

// kernel: mul_layer_discriminator_forward.8
= control target key start
LH: loop header
LB: loop body
LE: loop exit
PB: predicated region body
PF: predicated region fallthrough
CT: control target
= control target key end

     0   :  { %s1275_s29 = smov 0   ;;  %s1277_s30 = smov 0   ;;  %s1354_s0 = inlined_call_operand.vmem [shape: f32[2,16,128], index: 0, kind: input, shape index: {}]   ;;  %s1355_s1 = inlined_call_operand.vmem [shape: f32[2,1,16,4], index: 1, kind: input, shape index: {}]   ;;  %s1356_s2 = inlined_call_operand.vmem [shape: f32[2,1,16,3], index: 2, kind: input, shape index: {}]   ;;  %s1357_s3 = inlined_call_operand.vmem [shape: f32[16,128], index: 3, kind: input, shape index: {}]   ;;  %s1358_s4 = inlined_call_operand.vmem [shape: f32[16,1], index: 4, kind: input, shape index: {}, may-alias: {4,6}]   ;;  %s1359_s5 = inlined_call_operand.vmem [shape: f32[16,1], index: 5, kind: input, shape index: {}]   ;;  %s1360_s6 = inlined_call_operand.vmem [shape: f32[16,1], index: 6, kind: input, shape index: {}, may-alias: {4,6}]   ;;  %s1361_s7 = inlined_call_operand.vmem [shape: f32[2,16,128], index: 7, kind: output, shape index: {0}]   ;;  %s1362_s8 = inlined_call_operand.vmem [shape: f32[2,1,16,1], index: 8, kind: output, shape index: {1}]   ;;  %s1363_s9 = inlined_call_operand.vmem [shape: f32[2,1,16,1], index: 9, kind: output, shape index: {2}]  }
   0x1   :  { %s1279_s10 = smov 0  }
   0x2 LB: > { %s32_s5 = sadd.s32 1, %s1209_s30  ;;  %p969_p0 = scmp.ge.s32.totalorder %s1213_s10, 1  ;;  %s1213_s10 = sphi %s1279_s10, %s20_s10   ;;  %s1209_s30 = sphi %s1277_s30, %s1367_s30   ;;  %s1205_s29 = sphi %s1275_s29, %s1366_s29  }
   0x3   : > { %p34_p1 = scmp.ge.s32.totalorder %s32_s5, 2  ;;  %p347_p2 = scmp.lt.s32.totalorder %s1213_s10, 3 }
   0x5   : > { %s1369_s5 = smov (%p34_p1, %s32_s5), 0  ;;  %p348_p3 = pnand %p969_p0, %p347_p2 }
   0x6   : > { %p425_p4 = scmp.lt.s32.totalorder (!%p348_p3), %s1205_s29, 1  ;;  %s1215_s14 = smov (!%p348_p3), 4   ;;  %v506_v3 = vlaneseq (!%p348_p3)  ;;  %vm499_vm2 = vcmask (!%p348_p3), 31744   ;;  %v1216_v17 = vmov (!%p348_p3), 0.0   ;;  %v621_v20 = vld [vmem:[%s1357_s3] sm:$0xff] (!%p348_p3)  ;;  %v1223_v21 = vmov (!%p348_p3), 0  }
   0x7   : > { %351 = sbr.rel (%p348_p3) target bundleno = 654 (0x28e), region = 48  ;;  %s1217_s18 = smov (!%p348_p3), 127   ;;  %1043 = vmatprep.mubr.f32.mxu0 (!%p348_p3), %v621_v20  ;;  %1190 = vset.pattern.permute.xlu0 (!%p348_p3), %v1223_v21  ;;  %v623_v22 = vld [vmem:[%s1358_s4] sm:$0xff] (!%p348_p3)  ;;  %v624_v23 = vld [vmem:[%s1358_s4 + $0x8] sm:$0xff] (!%p348_p3)  ;;  %vm538_vm5 = vcmask (!%p348_p3), 1039360   ;;  %vm551_vm6 = vcmask (!%p348_p3), 1031168  }
   0x8   : > { %v1299_v4 = vand.u32 (!%p348_p3), 127, %v506_v3  ;;  %s1218_s19 = smov (!%p348_p3), 126   ;;  %s1219_s20 = smov (!%p348_p3), 125   ;;  %1189 = vset.pattern.permute.xlu1 (!%p348_p3), %v1223_v21  ;;  %vm564_vm7 = vcmask (!%p348_p3), 1022976   ;;  %vm577_vm8 = vcmask (!%p348_p3), 1014784   ;;  %vm590_vm9 = vcmask (!%p348_p3), 1006592  }
   0x9   : > { %s1220_s21 = smov (!%p348_p3), 124   ;;  %s1221_s22 = smov (!%p348_p3), 123   ;;  %vm603_vm10 = vcmask (!%p348_p3), 998400   ;;  %vm616_vm11 = vcmask (!%p348_p3), 990208   ;;  %vm723_vm13 = vcmask (!%p348_p3), 7168  }
   0xa   : > { %v510_v5 = vadd.s32 (!%p348_p3), 4294967292, %v1299_v4  ;;  %s1222_s25 = smov (!%p348_p3), 122   ;;  %s1224_s26 = smov (!%p348_p3), 121   ;;  %vm714_vm12 = vcmp.lt.s32.totalorder (!%p348_p3), %v1299_v4, 17 }
   0xc   : > { %vm512_vm0 = vcmp.ge.s32.totalorder (!%p348_p3), %v510_v5, 0  ;;  %vm514_vm1 = vcmp.lt.s32.totalorder (!%p348_p3), %v510_v5, 16 }
   0xd   : > { %vm1306_vm3 = vmand (!%p348_p3), %vm512_vm0, %vm514_vm1 }
   0xe   : > { %s1371_s29 = smov (!%p425_p4, %s1205_s29), 1  ;;  %vm1047_vm4 = vmpackc.low %vm1306_vm3, %vm1306_vm3 }
   0xf   : > { %s1293_s6 = sshll.u32 %s1371_s29, 4 }
  0x10   : > { %s432_s13 = scalar_lea.vmem %s1354_s0, %s1293_s6  ;;  %s441_s17 = scalar_lea.vmem %s1355_s1, %s1293_s6 }
  0x11   : > { %v479_v0 = vld [vmem:[%s432_s13] sm:$0xff]  ;;  %v480_v1 = vld [vmem:[%s432_s13 + $0x8] sm:$0xff]  ;;  %s458_s15 = scalar_lea.vmem %s1361_s7, %s1293_s6 }
  0x12   : > { %v1114_v2 = vpack.i.bf16 %v480_v1, %v479_v0  ;;  %v477_v7 = vld [vmem:[%s441_s17] sm:$0xff]  ;;  %v478_v8 = vld [vmem:[%s441_s17 + $0x8] sm:$0xff] }
  0x14   : > { %1115 = vrot.lane.b32.xlu0 %v1114_v2, %s1215_s14 }
  0x86   : > { %v1116_v6 = vpop.permute.xlu0 %1115 }
  0x87   : > { %v1118_v10 = vunpack.i.h.bf16 %v1116_v6  ;;  %v1117_v11 = vunpack.i.l.bf16 %v1116_v6 }
  0x89   : > { %v500_v12 = vsel %vm499_vm2, %v477_v7, %v1117_v11  ;;  %v501_v13 = vsel %vm499_vm2, %v478_v8, %v1118_v10 }
  0x8a   : > { %v522_v14 = vsel %vm1306_vm3, %v500_v12, 0.0  ;;  %v524_v15 = vsel %vm1306_vm3, %v501_v13, 0.0  ;;  %v1046_v16 = vpack.c.bf16 %v501_v13, %v500_v12 }
  0x8b   : > { %v1124_v18 = vpack.i.bf16 %v1216_v17, %v524_v15  ;;  %v1119_v19 = vpack.i.bf16 %v1216_v17, %v522_v14 }
  0x8c   : > { %1048 = vmatprep.subr.msk.bf16.mxu0 %vm1047_vm4, %v1046_v16 }
  0x8d   : > { %1125 = vrot.lane.b32.xlu1 %v1124_v18, %s1217_s18  ;;  %1051 = vmatpush3.bf16.msk.msra.mxu0 %vm1047_vm4, %v1046_v16 }
  0x8e   : > { %1120 = vrot.lane.b32.xlu0 %v1119_v19, %s1217_s18  ;;  %s467_s18 = scalar_lea.vmem %s1362_s8, %s1293_s6 }
  0x91   : > { %1130 = vrot.lane.b32.xlu1 %v1119_v19, %s1218_s19 }
  0x92   : > { %1135 = vrot.lane.b32.xlu0 %v1124_v18, %s1218_s19 }
  0x95   : > { %1140 = vrot.lane.b32.xlu1 %v1119_v19, %s1219_s20 }
  0x96   : > { %1145 = vrot.lane.b32.xlu0 %v1124_v18, %s1219_s20 }
  0x99   : > { %1150 = vrot.lane.b32.xlu1 %v1119_v19, %s1220_s21 }
  0x9a   : > { %1155 = vrot.lane.b32.xlu0 %v1124_v18, %s1220_s21  ;;  %s476_s21 = scalar_lea.vmem %s1363_s9, %s1293_s6 }
  0x9d   : > { %1160 = vrot.lane.b32.xlu1 %v1119_v19, %s1221_s22 }
  0x9e   : > { %1165 = vrot.lane.b32.xlu0 %v1124_v18, %s1221_s22 }
  0xa1   : > { %1170 = vrot.lane.b32.xlu1 %v1119_v19, %s1222_s25 }
  0xa2   : > { %1175 = vrot.lane.b32.xlu0 %v1124_v18, %s1222_s25 }
  0xa5   : > { %1180 = vrot.lane.b32.xlu1 %v1119_v19, %s1224_s26 }
  0xa6   : > { %1185 = vrot.lane.b32.xlu0 %v1124_v18, %s1224_s26 }
  0xa9   : > { %627 = vperm.xlu1 %1189, %v623_v22  }
  0xaa   : > { %632 = vperm.xlu0 %1190, %v624_v23  }
  0xff   : > { %v1126_v24 = vpop.permute.xlu1 %1125 }
 0x100   : > { %v1128_v25 = vunpack.i.h.bf16 %v1126_v24  ;;  %v1127_v26 = vunpack.i.l.bf16 %v1126_v24  ;;  %v1121_v27 = vpop.permute.xlu0 %1120 }
 0x101   : > { %v1123_v28 = vunpack.i.h.bf16 %v1121_v27  ;;  %v1122_v29 = vunpack.i.l.bf16 %v1121_v27 }
 0x102   : > { %v540_v30 = vsel %vm538_vm5, %v1127_v26, %v1128_v25  ;;  %v622_v25 = vld [vmem:[%s1357_s3 + $0x8] sm:$0xff] }
 0x103   : > { %v1131_v31 = vpop.permute.xlu1 %1130  ;;  %v539_v32 = vsel %vm538_vm5, %v1122_v29, %v1123_v28  ;;  %v984_v29 = vsel %vm714_vm12, 1.0, %v1216_v17 }
 0x104   : > { %v1133_v33 = vunpack.i.h.bf16 %v1131_v31  ;;  %v1132_v34 = vunpack.i.l.bf16 %v1131_v31  ;;  %v1136_v35 = vpop.permute.xlu0 %1135  ;;  %v1052_v36 = vpack.c.bf16 %v540_v30, %v539_v32 }
 0x105   : > { %v1138_v37 = vunpack.i.h.bf16 %v1136_v35  ;;  %v1137_v38 = vunpack.i.l.bf16 %v1136_v35 }
 0x106   : > { %1053 = vmatprep.subr.bf16.mxu0 %v1052_v36  ;;  %v552_v39 = vsel %vm551_vm6, %v1132_v34, %v1133_v33 }
 0x107   : > { %1055 = vmatpush3.bf16.msra.mxu0 %v1052_v36  ;;  %v1141_v40 = vpop.permute.xlu1 %1140  ;;  %v553_v41 = vsel %vm551_vm6, %v1137_v38, %v1138_v37 }
 0x108   : > { %v1143_v42 = vunpack.i.h.bf16 %v1141_v40  ;;  %v1142_v43 = vunpack.i.l.bf16 %v1141_v40  ;;  %v1146_v44 = vpop.permute.xlu0 %1145  ;;  %v1056_v45 = vpack.c.bf16 %v553_v41, %v552_v39 }
 0x109   : > { %v1148_v46 = vunpack.i.h.bf16 %v1146_v44  ;;  %v1147_v47 = vunpack.i.l.bf16 %v1146_v44 }
 0x10a   : > { %1057 = vmatprep.subr.bf16.mxu0 %v1056_v45  ;;  %v565_v48 = vsel %vm564_vm7, %v1142_v43, %v1143_v42 }
 0x10b   : > { %1059 = vmatpush3.bf16.msra.mxu0 %v1056_v45  ;;  %v1151_v49 = vpop.permute.xlu1 %1150  ;;  %v566_v50 = vsel %vm564_vm7, %v1147_v47, %v1148_v46 }
 0x10c   : > { %v1153_v51 = vunpack.i.h.bf16 %v1151_v49  ;;  %v1152_v52 = vunpack.i.l.bf16 %v1151_v49  ;;  %v1156_v53 = vpop.permute.xlu0 %1155  ;;  %v1060_v54 = vpack.c.bf16 %v566_v50, %v565_v48 }
 0x10d   : > { %v1158_v55 = vunpack.i.h.bf16 %v1156_v53  ;;  %v1157_v56 = vunpack.i.l.bf16 %v1156_v53 }
 0x10e   : > { %1061 = vmatprep.subr.bf16.mxu0 %v1060_v54  ;;  %v578_v57 = vsel %vm577_vm8, %v1152_v52, %v1153_v51 }
 0x10f   : > { %1063 = vmatpush3.bf16.msra.mxu0 %v1060_v54  ;;  %v1161_v58 = vpop.permute.xlu1 %1160  ;;  %v579_v59 = vsel %vm577_vm8, %v1157_v56, %v1158_v55 }
 0x110   : > { %v1163_v60 = vunpack.i.h.bf16 %v1161_v58  ;;  %v1162_v61 = vunpack.i.l.bf16 %v1161_v58  ;;  %v1166_v62 = vpop.permute.xlu0 %1165  ;;  %v1064_v63 = vpack.c.bf16 %v579_v59, %v578_v57 }
 0x111   : > { %v1168_v0 = vunpack.i.h.bf16 %v1166_v62  ;;  %v1167_v1 = vunpack.i.l.bf16 %v1166_v62 }
 0x112   : > { %1065 = vmatprep.subr.bf16.mxu0 %v1064_v63  ;;  %v591_v2 = vsel %vm590_vm9, %v1162_v61, %v1163_v60 }
 0x113   : > { %1067 = vmatpush3.bf16.msra.mxu0 %v1064_v63  ;;  %v1171_v3 = vpop.permute.xlu1 %1170  ;;  %v592_v5 = vsel %vm590_vm9, %v1167_v1, %v1168_v0 }
 0x114   : > { %v1173_v6 = vunpack.i.h.bf16 %v1171_v3  ;;  %v1172_v7 = vunpack.i.l.bf16 %v1171_v3  ;;  %v1176_v8 = vpop.permute.xlu0 %1175  ;;  %v1068_v9 = vpack.c.bf16 %v592_v5, %v591_v2 }
 0x115   : > { %v1178_v10 = vunpack.i.h.bf16 %v1176_v8  ;;  %v1177_v11 = vunpack.i.l.bf16 %v1176_v8 }
 0x116   : > { %1069 = vmatprep.subr.bf16.mxu0 %v1068_v9  ;;  %v604_v12 = vsel %vm603_vm10, %v1172_v7, %v1173_v6 }
 0x117   : > { %1071 = vmatpush3.bf16.msra.mxu0 %v1068_v9  ;;  %v1181_v13 = vpop.permute.xlu1 %1180  ;;  %v605_v14 = vsel %vm603_vm10, %v1177_v11, %v1178_v10 }
 0x118   : > { %v1183_v15 = vunpack.i.h.bf16 %v1181_v13  ;;  %v1182_v16 = vunpack.i.l.bf16 %v1181_v13  ;;  %v1186_v18 = vpop.permute.xlu0 %1185  ;;  %v1072_v19 = vpack.c.bf16 %v605_v14, %v604_v12 }
 0x119   : > { %v1188_v20 = vunpack.i.h.bf16 %v1186_v18  ;;  %v1187_v21 = vunpack.i.l.bf16 %v1186_v18 }
 0x11a   : > { %1073 = vmatprep.subr.bf16.mxu0 %v1072_v19  ;;  %v617_v22 = vsel %vm616_vm11, %v1182_v16, %v1183_v15 }
 0x11b   : > { %1075 = vmatpush3.bf16.msra.mxu0 %v1072_v19  ;;  %v618_v23 = vsel %vm616_vm11, %v1187_v21, %v1188_v20 }
 0x11c   : > { %v1076_v24 = vpack.c.bf16 %v618_v23, %v617_v22 }
 0x11e   : > { %1077 = vmatprep.subr.bf16.mxu0 %v1076_v24 }
 0x11f   : > { %1079 = vmatpush3.bf16.msra.mxu0 %v1076_v24 }
 0x122   : > { %1044 = vmatmul.mubr.f32.vlgmr.msra.gmra.mrb[0].mxu0 %v622_v25 }
 0x128   : > { %v628_v27 = vpop.permute.xlu1 %627 }
 0x129   : > { %v633_v26 = vpop.permute.xlu0 %632 }
 0x1f5   : > { %v1045_v28 = vpop.f32.mrb[0].mxu0 }
 0x1f6   : > { %v707_v30 = vadd.f32 %v1045_v28, %v633_v26  ;;  %v701_v31 = vpop.f32.mrb[1].mxu0 }
 0x1f7   : > { %v702_v32 = vadd.f32 %v701_v31, %v628_v27 }
 0x1f8   : > { %711 = vst [vmem:[%s458_s15 + $0x8] sm:$0xff] %v707_v30  ;;  %v718_v33 = vmul.f32 %v984_v29, %v707_v30 }
 0x1f9   : > { %710 = vst [vmem:[%s458_s15] sm:$0xff] %v702_v32  ;;  %v717_v34 = vmul.f32 %v984_v29, %v702_v32 }
 0x1fa   : > { %721 = vadd.xlane.f32.xlu0 %v718_v33  ;;  %v727_v4 = vmul.f32 %v718_v33, %v718_v33 }
 0x1fb   : > { %719 = vadd.xlane.f32.xlu1 %v717_v34  ;;  %v726_v35 = vmul.f32 %v717_v34, %v717_v34 }
 0x1fe   : > { %730 = vadd.xlane.f32.xlu0 %v727_v4 }
 0x1ff   : > { %728 = vadd.xlane.f32.xlu1 %v726_v35 }
 0x287   : > { %v722_v17 = vpop.xlane.xlu0 %721 }
 0x288   : > { %725 = vst.msk [vmem:[%s467_s18 + $0x8] sm:$0xff] %vm723_vm13, %v722_v17  ;;  %v720_v36 = vpop.xlane.xlu1 %719 }
 0x289   : > { %724 = vst.msk [vmem:[%s467_s18] sm:$0xff] %vm723_vm13, %v720_v36 }
 0x28b   : > { %v731_v37 = vpop.xlane.xlu0 %730 }
 0x28c   : > { %733 = vst.msk [vmem:[%s476_s21 + $0x8] sm:$0xff] %vm723_vm13, %v731_v37  ;;  %v729_v38 = vpop.xlane.xlu1 %728 }
 0x28d   : > { %732 = vst.msk [vmem:[%s476_s21] sm:$0xff] %vm723_vm13, %v729_v38 }
 0x28e PF: > { %s20_s10 = sadd.s32 1, %s1213_s10   ;;  %s1366_s29 = smov %s1209_s30 }
 0x28f   : > { %p17_p5 = scmp.ge.s32.totalorder %s20_s10, 4   ;;  %s1367_s30 = smov %s1369_s5 }
 0x291   :  { %19 = sbr.rel (!%p17_p5) target bundleno = 2 (0x2), region = 108 }

// kernel: mul_layer_discriminator_forward.10
= control target key start
LH: loop header
LB: loop body
LE: loop exit
PB: predicated region body
PF: predicated region fallthrough
CT: control target
= control target key end

     0   :  { %s1314_s29 = smov 0   ;;  %s1316_s30 = smov 0   ;;  %s1405_s0 = inlined_call_operand.vmem [shape: f32[2,16,128], index: 0, kind: input, shape index: {}]   ;;  %s1406_s1 = inlined_call_operand.vmem [shape: f32[2,1,16,4], index: 1, kind: input, shape index: {}]   ;;  %s1407_s2 = inlined_call_operand.vmem [shape: f32[2,1,16,3], index: 2, kind: input, shape index: {}]   ;;  %s1408_s3 = inlined_call_operand.vmem [shape: f32[16,128], index: 3, kind: input, shape index: {}]   ;;  %s1409_s4 = inlined_call_operand.vmem [shape: f32[16,1], index: 4, kind: input, shape index: {}]   ;;  %s1410_s5 = inlined_call_operand.vmem [shape: f32[16,1], index: 5, kind: input, shape index: {}]   ;;  %s1411_s6 = inlined_call_operand.vmem [shape: f32[16,1], index: 6, kind: input, shape index: {}]   ;;  %s1412_s7 = inlined_call_operand.vmem [shape: f32[2,16,128], index: 7, kind: output, shape index: {0}]   ;;  %s1413_s8 = inlined_call_operand.vmem [shape: f32[2,1,16,1], index: 8, kind: output, shape index: {1}]   ;;  %s1414_s9 = inlined_call_operand.vmem [shape: f32[2,1,16,1], index: 9, kind: output, shape index: {2}]  }
   0x1   :  { %s1318_s10 = smov 0  }
   0x2 LB: > { %s32_s11 = sadd.s32 1, %s1248_s30  ;;  %p1013_p0 = scmp.ge.s32.totalorder %s1252_s10, 1  ;;  %s1252_s10 = sphi %s1318_s10, %s20_s10   ;;  %s1248_s30 = sphi %s1316_s30, %s1418_s30   ;;  %s1244_s29 = sphi %s1314_s29, %s1417_s29  }
   0x3   : > { %p34_p1 = scmp.ge.s32.totalorder %s32_s11, 2  ;;  %p347_p2 = scmp.lt.s32.totalorder %s1252_s10, 3 }
   0x5   : > { %s1420_s11 = smov (%p34_p1, %s32_s11), 0  ;;  %p348_p3 = pnand %p1013_p0, %p347_p2 }
   0x6   : > { %v534_v0 = vld [vmem:[%s1411_s6] sm:$0xff] (!%p348_p3)  ;;  %p425_p4 = scmp.lt.s32.totalorder (!%p348_p3), %s1244_s29, 1  ;;  %v1254_v2 = vmov (!%p348_p3), 0   ;;  %v535_v3 = vld [vmem:[%s1411_s6 + $0x8] sm:$0xff] (!%p348_p3)  ;;  %s1255_s24 = smov (!%p348_p3), 4   ;;  %v506_v7 = vlaneseq (!%p348_p3)  ;;  %vm499_vm0 = vcmask (!%p348_p3), 31744  }
   0x7   : > { %351 = sbr.rel (%p348_p3) target bundleno = 672 (0x2a0), region = 48  ;;  %v518_v1 = vld [vmem:[%s1410_s5] sm:$0xff] (!%p348_p3)  ;;  %1159 = vset.pattern.permute.xlu1 (!%p348_p3), %v1254_v2  ;;  %1158 = vset.pattern.permute.xlu0 (!%p348_p3), %v1254_v2  ;;  %v519_v4 = vld [vmem:[%s1410_s5 + $0x8] sm:$0xff] (!%p348_p3)  ;;  %v1256_v32 = vmov (!%p348_p3), 0.0   ;;  %s1257_s28 = smov (!%p348_p3), 127   ;;  %vm582_vm7 = vcmask (!%p348_p3), 1039360  }
   0x8   : > { %538 = vperm.xlu1 (!%p348_p3), %1159, %v534_v0   ;;  %522 = vperm.xlu0 (!%p348_p3), %1158, %v518_v1   ;;  %v1350_v10 = vand.u32 (!%p348_p3), 127, %v506_v7  ;;  %s1258_s2 = smov (!%p348_p3), 126   ;;  %s1260_s12 = smov (!%p348_p3), 124   ;;  %v665_v35 = vld [vmem:[%s1408_s3] sm:$0xff] (!%p348_p3)  ;;  %v668_v36 = vld [vmem:[%s1409_s4 + $0x8] sm:$0xff] (!%p348_p3)  ;;  %vm595_vm8 = vcmask (!%p348_p3), 1031168  }
   0x9   : > { %s1261_s13 = smov (!%p348_p3), 123   ;;  %1087 = vmatprep.mubr.f32.mxu0 (!%p348_p3), %v665_v35  ;;  %s1262_s16 = smov (!%p348_p3), 122   ;;  %v667_v37 = vld [vmem:[%s1409_s4] sm:$0xff] (!%p348_p3)  ;;  %vm608_vm9 = vcmask (!%p348_p3), 1022976   ;;  %vm621_vm10 = vcmask (!%p348_p3), 1014784   ;;  %vm634_vm11 = vcmask (!%p348_p3), 1006592  }
   0xa   : > { %v510_v15 = vadd.s32 (!%p348_p3), 4294967292, %v1350_v10  ;;  %s1263_s17 = smov (!%p348_p3), 121   ;;  %vm647_vm12 = vcmask (!%p348_p3), 998400   ;;  %vm660_vm13 = vcmask (!%p348_p3), 990208   ;;  %vm758_vm14 = vcmp.lt.s32.totalorder (!%p348_p3), %v1350_v10, 19 }
   0xb   : > { %vm767_vm15 = vcmask (!%p348_p3), 7168  }
   0xc   : > { %543 = vperm.xlu1 (!%p348_p3), %1159, %v535_v3   ;;  %527 = vperm.xlu0 (!%p348_p3), %1158, %v519_v4   ;;  %vm512_vm1 = vcmp.ge.s32.totalorder (!%p348_p3), %v510_v15, 0  ;;  %vm514_vm2 = vcmp.lt.s32.totalorder (!%p348_p3), %v510_v15, 18 }
   0xd   : > { %vm1357_vm3 = vmand (!%p348_p3), %vm512_vm1, %vm514_vm2 }
   0xe   : > { %s1422_s29 = smov (!%p425_p4, %s1244_s29), 1  ;;  %vm1091_vm6 = vmpackc.low %vm1357_vm3, %vm1357_vm3 }
   0xf   : > { %s1344_s20 = sshll.u32 %s1422_s29, 4  ;;  %s1259_s29 = smov 125  }
  0x10   : > { %s432_s23 = scalar_lea.vmem %s1405_s0, %s1344_s20  ;;  %s441_s27 = scalar_lea.vmem %s1406_s1, %s1344_s20 }
  0x11   : > { %v480_v5 = vld [vmem:[%s432_s23 + $0x8] sm:$0xff]  ;;  %v479_v6 = vld [vmem:[%s432_s23] sm:$0xff]  ;;  %s476_s14 = scalar_lea.vmem %s1414_s9, %s1344_s20 }
  0x12   : > { %487 = vrot.lane.b32.xlu1 %v480_v5, %s1255_s24  ;;  %485 = vrot.lane.b32.xlu0 %v479_v6, %s1255_s24  ;;  %v478_v13 = vld [vmem:[%s441_s27 + $0x8] sm:$0xff]  ;;  %v477_v14 = vld [vmem:[%s441_s27] sm:$0xff]  ;;  %s458_s27 = scalar_lea.vmem %s1412_s7, %s1344_s20 }
  0x87   : > { %v539_v8 = vpop.permute.xlu1 %538  ;;  %v523_v9 = vpop.permute.xlu0 %522 }
  0x8b   : > { %v544_v11 = vpop.permute.xlu1 %543  ;;  %v528_v12 = vpop.permute.xlu0 %527 }
  0x8f   : > { %v488_v16 = vpop.permute.xlu1 %487  ;;  %v486_v17 = vpop.permute.xlu0 %485 }
  0x90   : > { %v501_v18 = vsel %vm499_vm0, %v478_v13, %v488_v16  ;;  %v500_v19 = vsel %vm499_vm0, %v477_v14, %v486_v17 }
  0x91   : > { %v532_v20 = vmul.f32 %v528_v12, %v501_v18  ;;  %v530_v21 = vmul.f32 %v523_v9, %v500_v19 }
  0x93   : > { %v548_v22 = vadd.f32 %v544_v11, %v532_v20  ;;  %v546_v23 = vadd.f32 %v539_v8, %v530_v21 }
  0x95   : > { %vm550_vm4 = vcmp.ge.f32.partialorder %v546_v23, 0.0  ;;  %vm552_vm5 = vcmp.ge.f32.partialorder %v548_v22, 0.0  ;;  %v554_v25 = vmul.f32 0.2, %v546_v23  ;;  %v556_v26 = vmul.f32 0.2, %v548_v22 }
  0x97   : > { %v558_v27 = vsel %vm550_vm4, %v546_v23, %v554_v25  ;;  %v560_v28 = vsel %vm552_vm5, %v548_v22, %v556_v26 }
  0x98   : > { %v566_v29 = vsel %vm1357_vm3, %v558_v27, 0.0  ;;  %v568_v30 = vsel %vm1357_vm3, %v560_v28, 0.0  ;;  %v1090_v31 = vpack.c.bf16 %v560_v28, %v558_v27 }
  0x99   : > { %v1165_v33 = vpack.i.bf16 %v1256_v32, %v568_v30  ;;  %v1160_v34 = vpack.i.bf16 %v1256_v32, %v566_v29 }
  0x9a   : > { %1092 = vmatprep.subr.msk.bf16.mxu0 %vm1091_vm6, %v1090_v31 }
  0x9b   : > { %1166 = vrot.lane.b32.xlu1 %v1165_v33, %s1257_s28  ;;  %1095 = vmatpush3.bf16.msk.msra.mxu0 %vm1091_vm6, %v1090_v31 }
  0x9c   : > { %1161 = vrot.lane.b32.xlu0 %v1160_v34, %s1257_s28 }
  0x9f   : > { %1176 = vrot.lane.b32.xlu1 %v1165_v33, %s1258_s2 }
  0xa0   : > { %1171 = vrot.lane.b32.xlu0 %v1160_v34, %s1258_s2 }
  0xa3   : > { %1186 = vrot.lane.b32.xlu1 %v1165_v33, %s1259_s29 }
  0xa4   : > { %1181 = vrot.lane.b32.xlu0 %v1160_v34, %s1259_s29  ;;  %s467_s29 = scalar_lea.vmem %s1413_s8, %s1344_s20 }
  0xa7   : > { %1196 = vrot.lane.b32.xlu1 %v1165_v33, %s1260_s12 }
  0xa8   : > { %1191 = vrot.lane.b32.xlu0 %v1160_v34, %s1260_s12 }
  0xab   : > { %1206 = vrot.lane.b32.xlu1 %v1165_v33, %s1261_s13 }
  0xac   : > { %1201 = vrot.lane.b32.xlu0 %v1160_v34, %s1261_s13 }
  0xaf   : > { %1216 = vrot.lane.b32.xlu1 %v1165_v33, %s1262_s16 }
  0xb0   : > { %1211 = vrot.lane.b32.xlu0 %v1160_v34, %s1262_s16 }
  0xb3   : > { %1226 = vrot.lane.b32.xlu1 %v1165_v33, %s1263_s17 }
  0xb4   : > { %1221 = vrot.lane.b32.xlu0 %v1160_v34, %s1263_s17 }
  0xb7   : > { %676 = vperm.xlu1 %1159, %v668_v36  }
  0xb8   : > { %671 = vperm.xlu0 %1158, %v667_v37  }
 0x10d   : > { %v1167_v38 = vpop.permute.xlu1 %1166 }
 0x10e   : > { %v1169_v39 = vunpack.i.h.bf16 %v1167_v38  ;;  %v1168_v40 = vunpack.i.l.bf16 %v1167_v38  ;;  %v1162_v41 = vpop.permute.xlu0 %1161 }
 0x10f   : > { %v1164_v42 = vunpack.i.h.bf16 %v1162_v41  ;;  %v1163_v43 = vunpack.i.l.bf16 %v1162_v41 }
 0x110   : > { %v584_v44 = vsel %vm582_vm7, %v1168_v40, %v1169_v39  ;;  %v666_v39 = vld [vmem:[%s1408_s3 + $0x8] sm:$0xff] }
 0x111   : > { %v1177_v45 = vpop.permute.xlu1 %1176  ;;  %v583_v46 = vsel %vm582_vm7, %v1163_v43, %v1164_v42  ;;  %v1028_v42 = vsel %vm758_vm14, 1.0, %v1256_v32 }
 0x112   : > { %v1179_v47 = vunpack.i.h.bf16 %v1177_v45  ;;  %v1178_v48 = vunpack.i.l.bf16 %v1177_v45  ;;  %v1172_v49 = vpop.permute.xlu0 %1171  ;;  %v1096_v50 = vpack.c.bf16 %v584_v44, %v583_v46 }
 0x113   : > { %v1174_v51 = vunpack.i.h.bf16 %v1172_v49  ;;  %v1173_v52 = vunpack.i.l.bf16 %v1172_v49 }
 0x114   : > { %1097 = vmatprep.subr.bf16.mxu0 %v1096_v50  ;;  %v597_v53 = vsel %vm595_vm8, %v1178_v48, %v1179_v47 }
 0x115   : > { %1099 = vmatpush3.bf16.msra.mxu0 %v1096_v50  ;;  %v1187_v54 = vpop.permute.xlu1 %1186  ;;  %v596_v55 = vsel %vm595_vm8, %v1173_v52, %v1174_v51 }
 0x116   : > { %v1189_v56 = vunpack.i.h.bf16 %v1187_v54  ;;  %v1188_v57 = vunpack.i.l.bf16 %v1187_v54  ;;  %v1182_v58 = vpop.permute.xlu0 %1181  ;;  %v1100_v59 = vpack.c.bf16 %v597_v53, %v596_v55 }
 0x117   : > { %v1184_v60 = vunpack.i.h.bf16 %v1182_v58  ;;  %v1183_v61 = vunpack.i.l.bf16 %v1182_v58 }
 0x118   : > { %1101 = vmatprep.subr.bf16.mxu0 %v1100_v59  ;;  %v610_v62 = vsel %vm608_vm9, %v1188_v57, %v1189_v56 }
 0x119   : > { %1103 = vmatpush3.bf16.msra.mxu0 %v1100_v59  ;;  %v1197_v63 = vpop.permute.xlu1 %1196  ;;  %v609_v0 = vsel %vm608_vm9, %v1183_v61, %v1184_v60 }
 0x11a   : > { %v1199_v1 = vunpack.i.h.bf16 %v1197_v63  ;;  %v1198_v2 = vunpack.i.l.bf16 %v1197_v63  ;;  %v1192_v3 = vpop.permute.xlu0 %1191  ;;  %v1104_v4 = vpack.c.bf16 %v610_v62, %v609_v0 }
 0x11b   : > { %v1194_v5 = vunpack.i.h.bf16 %v1192_v3  ;;  %v1193_v6 = vunpack.i.l.bf16 %v1192_v3 }
 0x11c   : > { %1105 = vmatprep.subr.bf16.mxu0 %v1104_v4  ;;  %v623_v7 = vsel %vm621_vm10, %v1198_v2, %v1199_v1 }
 0x11d   : > { %1107 = vmatpush3.bf16.msra.mxu0 %v1104_v4  ;;  %v1207_v8 = vpop.permute.xlu1 %1206  ;;  %v622_v9 = vsel %vm621_vm10, %v1193_v6, %v1194_v5 }
 0x11e   : > { %v1209_v11 = vunpack.i.h.bf16 %v1207_v8  ;;  %v1208_v12 = vunpack.i.l.bf16 %v1207_v8  ;;  %v1202_v13 = vpop.permute.xlu0 %1201  ;;  %v1108_v14 = vpack.c.bf16 %v623_v7, %v622_v9 }
 0x11f   : > { %v1204_v15 = vunpack.i.h.bf16 %v1202_v13  ;;  %v1203_v16 = vunpack.i.l.bf16 %v1202_v13 }
 0x120   : > { %1109 = vmatprep.subr.bf16.mxu0 %v1108_v14  ;;  %v636_v17 = vsel %vm634_vm11, %v1208_v12, %v1209_v11 }
 0x121   : > { %1111 = vmatpush3.bf16.msra.mxu0 %v1108_v14  ;;  %v1217_v18 = vpop.permute.xlu1 %1216  ;;  %v635_v19 = vsel %vm634_vm11, %v1203_v16, %v1204_v15 }
 0x122   : > { %v1219_v20 = vunpack.i.h.bf16 %v1217_v18  ;;  %v1218_v21 = vunpack.i.l.bf16 %v1217_v18  ;;  %v1212_v22 = vpop.permute.xlu0 %1211  ;;  %v1112_v23 = vpack.c.bf16 %v636_v17, %v635_v19 }
 0x123   : > { %v1214_v24 = vunpack.i.h.bf16 %v1212_v22  ;;  %v1213_v25 = vunpack.i.l.bf16 %v1212_v22 }
 0x124   : > { %1113 = vmatprep.subr.bf16.mxu0 %v1112_v23  ;;  %v649_v26 = vsel %vm647_vm12, %v1218_v21, %v1219_v20 }
 0x125   : > { %1115 = vmatpush3.bf16.msra.mxu0 %v1112_v23  ;;  %v1227_v27 = vpop.permute.xlu1 %1226  ;;  %v648_v28 = vsel %vm647_vm12, %v1213_v25, %v1214_v24 }
 0x126   : > { %v1229_v29 = vunpack.i.h.bf16 %v1227_v27  ;;  %v1228_v30 = vunpack.i.l.bf16 %v1227_v27  ;;  %v1222_v31 = vpop.permute.xlu0 %1221  ;;  %v1116_v33 = vpack.c.bf16 %v649_v26, %v648_v28 }
 0x127   : > { %v1224_v34 = vunpack.i.h.bf16 %v1222_v31  ;;  %v1223_v35 = vunpack.i.l.bf16 %v1222_v31 }
 0x128   : > { %1117 = vmatprep.subr.bf16.mxu0 %v1116_v33  ;;  %v662_v36 = vsel %vm660_vm13, %v1228_v30, %v1229_v29 }
 0x129   : > { %1119 = vmatpush3.bf16.msra.mxu0 %v1116_v33  ;;  %v661_v37 = vsel %vm660_vm13, %v1223_v35, %v1224_v34 }
 0x12a   : > { %v1120_v38 = vpack.c.bf16 %v662_v36, %v661_v37 }
 0x12c   : > { %1121 = vmatprep.subr.bf16.mxu0 %v1120_v38 }
 0x12d   : > { %1123 = vmatpush3.bf16.msra.mxu0 %v1120_v38 }
 0x130   : > { %1088 = vmatmul.mubr.f32.vlgmr.msra.gmra.mrb[0].mxu0 %v666_v39 }
 0x136   : > { %v677_v40 = vpop.permute.xlu1 %676 }
 0x137   : > { %v672_v43 = vpop.permute.xlu0 %671 }
 0x203   : > { %v1089_v41 = vpop.f32.mrb[0].mxu0 }
 0x204   : > { %v751_v44 = vadd.f32 %v1089_v41, %v677_v40  ;;  %v745_v45 = vpop.f32.mrb[1].mxu0 }
 0x205   : > { %v746_v46 = vadd.f32 %v745_v45, %v672_v43 }
 0x206   : > { %755 = vst [vmem:[%s458_s27 + $0x8] sm:$0xff] %v751_v44  ;;  %v762_v47 = vmul.f32 %v1028_v42, %v751_v44 }
 0x207   : > { %754 = vst [vmem:[%s458_s27] sm:$0xff] %v746_v46  ;;  %v761_v48 = vmul.f32 %v1028_v42, %v746_v46 }
 0x208   : > { %765 = vadd.xlane.f32.xlu1 %v762_v47  ;;  %v771_v49 = vmul.f32 %v762_v47, %v762_v47 }
 0x209   : > { %763 = vadd.xlane.f32.xlu0 %v761_v48  ;;  %v770_v10 = vmul.f32 %v761_v48, %v761_v48 }
 0x20d   : > { %772 = vadd.xlane.f32.xlu0 %v770_v10 }
 0x211   : > { %774 = vadd.xlane.f32.xlu0 %v771_v49 }
 0x295   : > { %v766_v32 = vpop.xlane.xlu1 %765 }
 0x296   : > { %769 = vst.msk [vmem:[%s467_s29 + $0x8] sm:$0xff] %vm767_vm15, %v766_v32  ;;  %v764_v50 = vpop.xlane.xlu0 %763 }
 0x297   : > { %768 = vst.msk [vmem:[%s467_s29] sm:$0xff] %vm767_vm15, %v764_v50 }
 0x29a   : > { %v773_v51 = vpop.xlane.xlu0 %772 }
 0x29b   : > { %776 = vst.msk [vmem:[%s476_s14] sm:$0xff] %vm767_vm15, %v773_v51 }
 0x29e   : > { %v775_v52 = vpop.xlane.xlu0 %774 }
 0x29f   : > { %777 = vst.msk [vmem:[%s476_s14 + $0x8] sm:$0xff] %vm767_vm15, %v775_v52 }
 0x2a0 PF: > { %s20_s10 = sadd.s32 1, %s1252_s10   ;;  %s1417_s29 = smov %s1248_s30 }
 0x2a1   : > { %p17_p5 = scmp.ge.s32.totalorder %s20_s10, 4   ;;  %s1418_s30 = smov %s1420_s11 }
 0x2a3   :  { %19 = sbr.rel (!%p17_p5) target bundleno = 2 (0x2), region = 108 }

// kernel: mul_layer_discriminator_forward.9
= control target key start
LH: loop header
LB: loop body
LE: loop exit
PB: predicated region body
PF: predicated region fallthrough
CT: control target
= control target key end

     0   :  { %s1314_s29 = smov 0   ;;  %s1316_s30 = smov 0   ;;  %s1405_s0 = inlined_call_operand.vmem [shape: f32[2,16,128], index: 0, kind: input, shape index: {}]   ;;  %s1406_s1 = inlined_call_operand.vmem [shape: f32[2,1,16,4], index: 1, kind: input, shape index: {}]   ;;  %s1407_s2 = inlined_call_operand.vmem [shape: f32[2,1,16,3], index: 2, kind: input, shape index: {}]   ;;  %s1408_s3 = inlined_call_operand.vmem [shape: f32[16,128], index: 3, kind: input, shape index: {}]   ;;  %s1409_s4 = inlined_call_operand.vmem [shape: f32[16,1], index: 4, kind: input, shape index: {}]   ;;  %s1410_s5 = inlined_call_operand.vmem [shape: f32[16,1], index: 5, kind: input, shape index: {}]   ;;  %s1411_s6 = inlined_call_operand.vmem [shape: f32[16,1], index: 6, kind: input, shape index: {}]   ;;  %s1412_s7 = inlined_call_operand.vmem [shape: f32[2,16,128], index: 7, kind: output, shape index: {0}]   ;;  %s1413_s8 = inlined_call_operand.vmem [shape: f32[2,1,16,1], index: 8, kind: output, shape index: {1}]   ;;  %s1414_s9 = inlined_call_operand.vmem [shape: f32[2,1,16,1], index: 9, kind: output, shape index: {2}]  }
   0x1   :  { %s1318_s10 = smov 0  }
   0x2 LB: > { %s32_s11 = sadd.s32 1, %s1248_s30  ;;  %p1013_p0 = scmp.ge.s32.totalorder %s1252_s10, 1  ;;  %s1252_s10 = sphi %s1318_s10, %s20_s10   ;;  %s1248_s30 = sphi %s1316_s30, %s1418_s30   ;;  %s1244_s29 = sphi %s1314_s29, %s1417_s29  }
   0x3   : > { %p34_p1 = scmp.ge.s32.totalorder %s32_s11, 2  ;;  %p347_p2 = scmp.lt.s32.totalorder %s1252_s10, 3 }
   0x5   : > { %s1420_s11 = smov (%p34_p1, %s32_s11), 0  ;;  %p348_p3 = pnand %p1013_p0, %p347_p2 }
   0x6   : > { %v534_v0 = vld [vmem:[%s1411_s6] sm:$0xff] (!%p348_p3)  ;;  %p425_p4 = scmp.lt.s32.totalorder (!%p348_p3), %s1244_s29, 1  ;;  %v1254_v2 = vmov (!%p348_p3), 0   ;;  %v535_v3 = vld [vmem:[%s1411_s6 + $0x8] sm:$0xff] (!%p348_p3)  ;;  %s1255_s24 = smov (!%p348_p3), 4   ;;  %v506_v7 = vlaneseq (!%p348_p3)  ;;  %vm499_vm0 = vcmask (!%p348_p3), 31744  }
   0x7   : > { %351 = sbr.rel (%p348_p3) target bundleno = 672 (0x2a0), region = 48  ;;  %v518_v1 = vld [vmem:[%s1410_s5] sm:$0xff] (!%p348_p3)  ;;  %1159 = vset.pattern.permute.xlu1 (!%p348_p3), %v1254_v2  ;;  %1158 = vset.pattern.permute.xlu0 (!%p348_p3), %v1254_v2  ;;  %v519_v4 = vld [vmem:[%s1410_s5 + $0x8] sm:$0xff] (!%p348_p3)  ;;  %v1256_v32 = vmov (!%p348_p3), 0.0   ;;  %s1257_s28 = smov (!%p348_p3), 127   ;;  %vm582_vm7 = vcmask (!%p348_p3), 1039360  }
   0x8   : > { %538 = vperm.xlu1 (!%p348_p3), %1159, %v534_v0   ;;  %522 = vperm.xlu0 (!%p348_p3), %1158, %v518_v1   ;;  %v1350_v10 = vand.u32 (!%p348_p3), 127, %v506_v7  ;;  %s1258_s2 = smov (!%p348_p3), 126   ;;  %s1260_s12 = smov (!%p348_p3), 124   ;;  %v665_v35 = vld [vmem:[%s1408_s3] sm:$0xff] (!%p348_p3)  ;;  %v668_v36 = vld [vmem:[%s1409_s4 + $0x8] sm:$0xff] (!%p348_p3)  ;;  %vm595_vm8 = vcmask (!%p348_p3), 1031168  }
   0x9   : > { %s1261_s13 = smov (!%p348_p3), 123   ;;  %1087 = vmatprep.mubr.f32.mxu0 (!%p348_p3), %v665_v35  ;;  %s1262_s16 = smov (!%p348_p3), 122   ;;  %v667_v37 = vld [vmem:[%s1409_s4] sm:$0xff] (!%p348_p3)  ;;  %vm608_vm9 = vcmask (!%p348_p3), 1022976   ;;  %vm621_vm10 = vcmask (!%p348_p3), 1014784   ;;  %vm634_vm11 = vcmask (!%p348_p3), 1006592  }
   0xa   : > { %v510_v15 = vadd.s32 (!%p348_p3), 4294967292, %v1350_v10  ;;  %s1263_s17 = smov (!%p348_p3), 121   ;;  %vm647_vm12 = vcmask (!%p348_p3), 998400   ;;  %vm660_vm13 = vcmask (!%p348_p3), 990208   ;;  %vm758_vm14 = vcmp.lt.s32.totalorder (!%p348_p3), %v1350_v10, 18 }
   0xb   : > { %vm767_vm15 = vcmask (!%p348_p3), 7168  }
   0xc   : > { %543 = vperm.xlu1 (!%p348_p3), %1159, %v535_v3   ;;  %527 = vperm.xlu0 (!%p348_p3), %1158, %v519_v4   ;;  %vm512_vm1 = vcmp.ge.s32.totalorder (!%p348_p3), %v510_v15, 0  ;;  %vm514_vm2 = vcmp.lt.s32.totalorder (!%p348_p3), %v510_v15, 17 }
   0xd   : > { %vm1357_vm3 = vmand (!%p348_p3), %vm512_vm1, %vm514_vm2 }
   0xe   : > { %s1422_s29 = smov (!%p425_p4, %s1244_s29), 1  ;;  %vm1091_vm6 = vmpackc.low %vm1357_vm3, %vm1357_vm3 }
   0xf   : > { %s1344_s20 = sshll.u32 %s1422_s29, 4  ;;  %s1259_s29 = smov 125  }
  0x10   : > { %s432_s23 = scalar_lea.vmem %s1405_s0, %s1344_s20  ;;  %s441_s27 = scalar_lea.vmem %s1406_s1, %s1344_s20 }
  0x11   : > { %v480_v5 = vld [vmem:[%s432_s23 + $0x8] sm:$0xff]  ;;  %v479_v6 = vld [vmem:[%s432_s23] sm:$0xff]  ;;  %s476_s14 = scalar_lea.vmem %s1414_s9, %s1344_s20 }
  0x12   : > { %487 = vrot.lane.b32.xlu1 %v480_v5, %s1255_s24  ;;  %485 = vrot.lane.b32.xlu0 %v479_v6, %s1255_s24  ;;  %v478_v13 = vld [vmem:[%s441_s27 + $0x8] sm:$0xff]  ;;  %v477_v14 = vld [vmem:[%s441_s27] sm:$0xff]  ;;  %s458_s27 = scalar_lea.vmem %s1412_s7, %s1344_s20 }
  0x87   : > { %v539_v8 = vpop.permute.xlu1 %538  ;;  %v523_v9 = vpop.permute.xlu0 %522 }
  0x8b   : > { %v544_v11 = vpop.permute.xlu1 %543  ;;  %v528_v12 = vpop.permute.xlu0 %527 }
  0x8f   : > { %v488_v16 = vpop.permute.xlu1 %487  ;;  %v486_v17 = vpop.permute.xlu0 %485 }
  0x90   : > { %v501_v18 = vsel %vm499_vm0, %v478_v13, %v488_v16  ;;  %v500_v19 = vsel %vm499_vm0, %v477_v14, %v486_v17 }
  0x91   : > { %v532_v20 = vmul.f32 %v528_v12, %v501_v18  ;;  %v530_v21 = vmul.f32 %v523_v9, %v500_v19 }
  0x93   : > { %v548_v22 = vadd.f32 %v544_v11, %v532_v20  ;;  %v546_v23 = vadd.f32 %v539_v8, %v530_v21 }
  0x95   : > { %vm550_vm4 = vcmp.ge.f32.partialorder %v546_v23, 0.0  ;;  %vm552_vm5 = vcmp.ge.f32.partialorder %v548_v22, 0.0  ;;  %v554_v25 = vmul.f32 0.2, %v546_v23  ;;  %v556_v26 = vmul.f32 0.2, %v548_v22 }
  0x97   : > { %v558_v27 = vsel %vm550_vm4, %v546_v23, %v554_v25  ;;  %v560_v28 = vsel %vm552_vm5, %v548_v22, %v556_v26 }
  0x98   : > { %v566_v29 = vsel %vm1357_vm3, %v558_v27, 0.0  ;;  %v568_v30 = vsel %vm1357_vm3, %v560_v28, 0.0  ;;  %v1090_v31 = vpack.c.bf16 %v560_v28, %v558_v27 }
  0x99   : > { %v1165_v33 = vpack.i.bf16 %v1256_v32, %v568_v30  ;;  %v1160_v34 = vpack.i.bf16 %v1256_v32, %v566_v29 }
  0x9a   : > { %1092 = vmatprep.subr.msk.bf16.mxu0 %vm1091_vm6, %v1090_v31 }
  0x9b   : > { %1166 = vrot.lane.b32.xlu1 %v1165_v33, %s1257_s28  ;;  %1095 = vmatpush3.bf16.msk.msra.mxu0 %vm1091_vm6, %v1090_v31 }
  0x9c   : > { %1161 = vrot.lane.b32.xlu0 %v1160_v34, %s1257_s28 }
  0x9f   : > { %1176 = vrot.lane.b32.xlu1 %v1165_v33, %s1258_s2 }
  0xa0   : > { %1171 = vrot.lane.b32.xlu0 %v1160_v34, %s1258_s2 }
  0xa3   : > { %1186 = vrot.lane.b32.xlu1 %v1165_v33, %s1259_s29 }
  0xa4   : > { %1181 = vrot.lane.b32.xlu0 %v1160_v34, %s1259_s29  ;;  %s467_s29 = scalar_lea.vmem %s1413_s8, %s1344_s20 }
  0xa7   : > { %1196 = vrot.lane.b32.xlu1 %v1165_v33, %s1260_s12 }
  0xa8   : > { %1191 = vrot.lane.b32.xlu0 %v1160_v34, %s1260_s12 }
  0xab   : > { %1206 = vrot.lane.b32.xlu1 %v1165_v33, %s1261_s13 }
  0xac   : > { %1201 = vrot.lane.b32.xlu0 %v1160_v34, %s1261_s13 }
  0xaf   : > { %1216 = vrot.lane.b32.xlu1 %v1165_v33, %s1262_s16 }
  0xb0   : > { %1211 = vrot.lane.b32.xlu0 %v1160_v34, %s1262_s16 }
  0xb3   : > { %1226 = vrot.lane.b32.xlu1 %v1165_v33, %s1263_s17 }
  0xb4   : > { %1221 = vrot.lane.b32.xlu0 %v1160_v34, %s1263_s17 }
  0xb7   : > { %676 = vperm.xlu1 %1159, %v668_v36  }
  0xb8   : > { %671 = vperm.xlu0 %1158, %v667_v37  }
 0x10d   : > { %v1167_v38 = vpop.permute.xlu1 %1166 }
 0x10e   : > { %v1169_v39 = vunpack.i.h.bf16 %v1167_v38  ;;  %v1168_v40 = vunpack.i.l.bf16 %v1167_v38  ;;  %v1162_v41 = vpop.permute.xlu0 %1161 }
 0x10f   : > { %v1164_v42 = vunpack.i.h.bf16 %v1162_v41  ;;  %v1163_v43 = vunpack.i.l.bf16 %v1162_v41 }
 0x110   : > { %v584_v44 = vsel %vm582_vm7, %v1168_v40, %v1169_v39  ;;  %v666_v39 = vld [vmem:[%s1408_s3 + $0x8] sm:$0xff] }
 0x111   : > { %v1177_v45 = vpop.permute.xlu1 %1176  ;;  %v583_v46 = vsel %vm582_vm7, %v1163_v43, %v1164_v42  ;;  %v1028_v42 = vsel %vm758_vm14, 1.0, %v1256_v32 }
 0x112   : > { %v1179_v47 = vunpack.i.h.bf16 %v1177_v45  ;;  %v1178_v48 = vunpack.i.l.bf16 %v1177_v45  ;;  %v1172_v49 = vpop.permute.xlu0 %1171  ;;  %v1096_v50 = vpack.c.bf16 %v584_v44, %v583_v46 }
 0x113   : > { %v1174_v51 = vunpack.i.h.bf16 %v1172_v49  ;;  %v1173_v52 = vunpack.i.l.bf16 %v1172_v49 }
 0x114   : > { %1097 = vmatprep.subr.bf16.mxu0 %v1096_v50  ;;  %v597_v53 = vsel %vm595_vm8, %v1178_v48, %v1179_v47 }
 0x115   : > { %1099 = vmatpush3.bf16.msra.mxu0 %v1096_v50  ;;  %v1187_v54 = vpop.permute.xlu1 %1186  ;;  %v596_v55 = vsel %vm595_vm8, %v1173_v52, %v1174_v51 }
 0x116   : > { %v1189_v56 = vunpack.i.h.bf16 %v1187_v54  ;;  %v1188_v57 = vunpack.i.l.bf16 %v1187_v54  ;;  %v1182_v58 = vpop.permute.xlu0 %1181  ;;  %v1100_v59 = vpack.c.bf16 %v597_v53, %v596_v55 }
 0x117   : > { %v1184_v60 = vunpack.i.h.bf16 %v1182_v58  ;;  %v1183_v61 = vunpack.i.l.bf16 %v1182_v58 }
 0x118   : > { %1101 = vmatprep.subr.bf16.mxu0 %v1100_v59  ;;  %v610_v62 = vsel %vm608_vm9, %v1188_v57, %v1189_v56 }
 0x119   : > { %1103 = vmatpush3.bf16.msra.mxu0 %v1100_v59  ;;  %v1197_v63 = vpop.permute.xlu1 %1196  ;;  %v609_v0 = vsel %vm608_vm9, %v1183_v61, %v1184_v60 }
 0x11a   : > { %v1199_v1 = vunpack.i.h.bf16 %v1197_v63  ;;  %v1198_v2 = vunpack.i.l.bf16 %v1197_v63  ;;  %v1192_v3 = vpop.permute.xlu0 %1191  ;;  %v1104_v4 = vpack.c.bf16 %v610_v62, %v609_v0 }
 0x11b   : > { %v1194_v5 = vunpack.i.h.bf16 %v1192_v3  ;;  %v1193_v6 = vunpack.i.l.bf16 %v1192_v3 }
 0x11c   : > { %1105 = vmatprep.subr.bf16.mxu0 %v1104_v4  ;;  %v623_v7 = vsel %vm621_vm10, %v1198_v2, %v1199_v1 }
 0x11d   : > { %1107 = vmatpush3.bf16.msra.mxu0 %v1104_v4  ;;  %v1207_v8 = vpop.permute.xlu1 %1206  ;;  %v622_v9 = vsel %vm621_vm10, %v1193_v6, %v1194_v5 }
 0x11e   : > { %v1209_v11 = vunpack.i.h.bf16 %v1207_v8  ;;  %v1208_v12 = vunpack.i.l.bf16 %v1207_v8  ;;  %v1202_v13 = vpop.permute.xlu0 %1201  ;;  %v1108_v14 = vpack.c.bf16 %v623_v7, %v622_v9 }
 0x11f   : > { %v1204_v15 = vunpack.i.h.bf16 %v1202_v13  ;;  %v1203_v16 = vunpack.i.l.bf16 %v1202_v13 }
 0x120   : > { %1109 = vmatprep.subr.bf16.mxu0 %v1108_v14  ;;  %v636_v17 = vsel %vm634_vm11, %v1208_v12, %v1209_v11 }
 0x121   : > { %1111 = vmatpush3.bf16.msra.mxu0 %v1108_v14  ;;  %v1217_v18 = vpop.permute.xlu1 %1216  ;;  %v635_v19 = vsel %vm634_vm11, %v1203_v16, %v1204_v15 }
 0x122   : > { %v1219_v20 = vunpack.i.h.bf16 %v1217_v18  ;;  %v1218_v21 = vunpack.i.l.bf16 %v1217_v18  ;;  %v1212_v22 = vpop.permute.xlu0 %1211  ;;  %v1112_v23 = vpack.c.bf16 %v636_v17, %v635_v19 }
 0x123   : > { %v1214_v24 = vunpack.i.h.bf16 %v1212_v22  ;;  %v1213_v25 = vunpack.i.l.bf16 %v1212_v22 }
 0x124   : > { %1113 = vmatprep.subr.bf16.mxu0 %v1112_v23  ;;  %v649_v26 = vsel %vm647_vm12, %v1218_v21, %v1219_v20 }
 0x125   : > { %1115 = vmatpush3.bf16.msra.mxu0 %v1112_v23  ;;  %v1227_v27 = vpop.permute.xlu1 %1226  ;;  %v648_v28 = vsel %vm647_vm12, %v1213_v25, %v1214_v24 }
 0x126   : > { %v1229_v29 = vunpack.i.h.bf16 %v1227_v27  ;;  %v1228_v30 = vunpack.i.l.bf16 %v1227_v27  ;;  %v1222_v31 = vpop.permute.xlu0 %1221  ;;  %v1116_v33 = vpack.c.bf16 %v649_v26, %v648_v28 }
 0x127   : > { %v1224_v34 = vunpack.i.h.bf16 %v1222_v31  ;;  %v1223_v35 = vunpack.i.l.bf16 %v1222_v31 }
 0x128   : > { %1117 = vmatprep.subr.bf16.mxu0 %v1116_v33  ;;  %v662_v36 = vsel %vm660_vm13, %v1228_v30, %v1229_v29 }
 0x129   : > { %1119 = vmatpush3.bf16.msra.mxu0 %v1116_v33  ;;  %v661_v37 = vsel %vm660_vm13, %v1223_v35, %v1224_v34 }
 0x12a   : > { %v1120_v38 = vpack.c.bf16 %v662_v36, %v661_v37 }
 0x12c   : > { %1121 = vmatprep.subr.bf16.mxu0 %v1120_v38 }
 0x12d   : > { %1123 = vmatpush3.bf16.msra.mxu0 %v1120_v38 }
 0x130   : > { %1088 = vmatmul.mubr.f32.vlgmr.msra.gmra.mrb[0].mxu0 %v666_v39 }
 0x136   : > { %v677_v40 = vpop.permute.xlu1 %676 }
 0x137   : > { %v672_v43 = vpop.permute.xlu0 %671 }
 0x203   : > { %v1089_v41 = vpop.f32.mrb[0].mxu0 }
 0x204   : > { %v751_v44 = vadd.f32 %v1089_v41, %v677_v40  ;;  %v745_v45 = vpop.f32.mrb[1].mxu0 }
 0x205   : > { %v746_v46 = vadd.f32 %v745_v45, %v672_v43 }
 0x206   : > { %755 = vst [vmem:[%s458_s27 + $0x8] sm:$0xff] %v751_v44  ;;  %v762_v47 = vmul.f32 %v1028_v42, %v751_v44 }
 0x207   : > { %754 = vst [vmem:[%s458_s27] sm:$0xff] %v746_v46  ;;  %v761_v48 = vmul.f32 %v1028_v42, %v746_v46 }
 0x208   : > { %765 = vadd.xlane.f32.xlu1 %v762_v47  ;;  %v771_v49 = vmul.f32 %v762_v47, %v762_v47 }
 0x209   : > { %763 = vadd.xlane.f32.xlu0 %v761_v48  ;;  %v770_v10 = vmul.f32 %v761_v48, %v761_v48 }
 0x20d   : > { %772 = vadd.xlane.f32.xlu0 %v770_v10 }
 0x211   : > { %774 = vadd.xlane.f32.xlu0 %v771_v49 }
 0x295   : > { %v766_v32 = vpop.xlane.xlu1 %765 }
 0x296   : > { %769 = vst.msk [vmem:[%s467_s29 + $0x8] sm:$0xff] %vm767_vm15, %v766_v32  ;;  %v764_v50 = vpop.xlane.xlu0 %763 }
 0x297   : > { %768 = vst.msk [vmem:[%s467_s29] sm:$0xff] %vm767_vm15, %v764_v50 }
 0x29a   : > { %v773_v51 = vpop.xlane.xlu0 %772 }
 0x29b   : > { %776 = vst.msk [vmem:[%s476_s14] sm:$0xff] %vm767_vm15, %v773_v51 }
 0x29e   : > { %v775_v52 = vpop.xlane.xlu0 %774 }
 0x29f   : > { %777 = vst.msk [vmem:[%s476_s14 + $0x8] sm:$0xff] %vm767_vm15, %v775_v52 }
 0x2a0 PF: > { %s20_s10 = sadd.s32 1, %s1252_s10   ;;  %s1417_s29 = smov %s1248_s30 }
 0x2a1   : > { %p17_p5 = scmp.ge.s32.totalorder %s20_s10, 4   ;;  %s1418_s30 = smov %s1420_s11 }
 0x2a3   :  { %19 = sbr.rel (!%p17_p5) target bundleno = 2 (0x2), region = 108 }

// kernel: mul_layer_discriminator_forward.11
= control target key start
LH: loop header
LB: loop body
LE: loop exit
PB: predicated region body
PF: predicated region fallthrough
CT: control target
= control target key end

     0   :  { %s1119_s0 = inlined_call_operand.vmem [shape: f32[2,16,128], index: 0, kind: input, shape index: {}]   ;;  %s1120_s1 = inlined_call_operand.vmem [shape: f32[2,1,16,1], index: 1, kind: input, shape index: {}, may-alias: {1,2}]   ;;  %s1121_s2 = inlined_call_operand.vmem [shape: f32[2,1,16,1], index: 2, kind: input, shape index: {}, may-alias: {1,2}]   ;;  %s1122_s3 = inlined_call_operand.vmem [shape: f32[1,48], index: 3, kind: input, shape index: {}]   ;;  %s1123_s4 = inlined_call_operand.<no memory space> [shape: f32[1,1], index: 4, kind: input, shape index: {}]   ;;  %s1124_s5 = inlined_call_operand.vmem [shape: f32[16,1], index: 5, kind: input, shape index: {}]   ;;  %s1125_s6 = inlined_call_operand.vmem [shape: f32[16,1], index: 6, kind: input, shape index: {}]   ;;  %s1126_s7 = inlined_call_operand.hbm [shape: f32[2,1,128], index: 7, kind: output, shape index: {}]  }
   0x1   :  { %v12_v0 = vstv %s1123_s4 }
   0x2   :  { %13 = vst [vmem:[#allocation2] sm:$0x1] %v12_v0 }
   0x3   :  { %14 = vsyncpa [#allocation4], 0 }
   0x4   :  { %16 = vsyncpa [#allocation4 + $0x1], 0  ;;  %s973_s2 = smov 0   ;;  %s975_s26 = smov 0  }
   0x5   :  { %s977_s27 = smov 0   ;;  %s979_s28 = smov 0  }
   0x6   :  { %s981_s29 = smov 0   ;;  %s983_s30 = smov 0  }
   0x7 LB: > { %s706_s4 = sadd.s32 4294967295, %s920_s30   ;;  %s707_s8 = sadd.s32 4294967294, %s920_s30   ;;  %s920_s30 = sphi %s983_s30, %s22_s30   ;;  %s916_s29 = sphi %s981_s29, %s1135_s29   ;;  %s912_s28 = sphi %s979_s28, %s1134_s28   ;;  %s908_s27 = sphi %s977_s27, %s1133_s27   ;;  %s904_s26 = sphi %s975_s26, %s1132_s26   ;;  %s900_s2 = sphi %s973_s2, %s1131_s2  }
   0x8   : > { %s34_s9 = sadd.s32 1, %s916_s29  ;;  %s211_s10 = sadd.s32 1, %s908_s27 }
   0x9   : > { %p36_p0 = scmp.ge.s32.totalorder %s34_s9, 2  ;;  %p221_p1 = scmp.ne.s32.totalorder %s908_s27, %s904_s26 }
   0xa   : > { %p222_p2 = scmp.eq.s32.totalorder %s706_s4, 1  ;;  %p227_p3 = scmp.ne.s32.totalorder %s904_s26, %s900_s2 }
   0xb   : > { %s1137_s9 = smov (%p36_p0, %s34_s9), 0  ;;  %p228_p5 = scmp.eq.s32.totalorder %s707_s8, 1 }
   0xc   : > { %p1013_p4 = por %p222_p2, %p221_p1  ;;  %s206_s12 = ssub.s32 %s916_s29, %s1137_s9 }
   0xd   : > { %p710_p6 = scmp.ge.s32.totalorder %s920_s30, 1  ;;  %p209_p7 = scmp.eq.s32.totalorder %s206_s12, 0 }
   0xe   : > { %p1020_p8 = por %p228_p5, %p227_p3  ;;  %p293_p9 = scmp.lt.s32.totalorder %s920_s30, 3 }
   0xf   : > { %s1026_s14 = scalar_select %p209_p7, %s908_s27, %s211_s10  }
  0x10   : > { %p294_p10 = pnand %p710_p6, %p293_p9 }
  0x11   : > { %v428_v1 = vld [vmem:[%s1125_s6] sm:$0xff] (!%p294_p10)  ;;  %p345_p11 = scmp.lt.s32.totalorder (!%p294_p10), %s912_s28, 1  ;;  %v922_v3 = vmov (!%p294_p10), 0   ;;  %v429_v4 = vld [vmem:[%s1125_s6 + $0x8] sm:$0xff] (!%p294_p10)  ;;  %s923_s10 = smov (!%p294_p10), 1   ;;  %v924_v8 = vmov (!%p294_p10), 0.0|0.0   ;;  %v400_v9 = vlaneseq (!%p294_p10) }
  0x12   : > { %297 = sbr.rel (%p294_p10) target bundleno = 521 (0x209), region = 48  ;;  %v412_v2 = vld [vmem:[%s1124_s5] sm:$0xff] (!%p294_p10)  ;;  %821 = vset.pattern.permute.xlu1 (!%p294_p10), %v922_v3  ;;  %820 = vset.pattern.permute.xlu0 (!%p294_p10), %v922_v3  ;;  %v413_v5 = vld [vmem:[%s1124_s5 + $0x8] sm:$0xff] (!%p294_p10)  ;;  %vm393_vm0 = vcmask (!%p294_p10), 7168   ;;  %vm925_vm7 = vmmov (!%p294_p10), 0   ;;  %v926_v34 = vmov (!%p294_p10), 0.0  }
  0x13   : > { %432 = vperm.xlu1 (!%p294_p10), %821, %v428_v1   ;;  %416 = vperm.xlu0 (!%p294_p10), %820, %v412_v2   ;;  %v401_v12 = vand.u32 (!%p294_p10), 127, %v400_v9  ;;  %s927_s17 = smov (!%p294_p10), 127   ;;  %s928_s18 = smov (!%p294_p10), 126   ;;  %v495_v37 = vld [vmem:[#allocation2] sm:$0x1] (!%p294_p10)  ;;  %vm476_vm8 = vcmask (!%p294_p10), 1039360  }
  0x14   : > { %748 = vmatprep.subr.bf16.mxu0 (!%p294_p10), %v924_v8  ;;  %745 = vmatprep.mubr.msk.f32.mxu0 (!%p294_p10), %vm925_vm7, %v926_v34  ;;  %vm489_vm9 = vcmask (!%p294_p10), 1031168   ;;  %v494_v56 = vld [vmem:[%s1122_s3] sm:$0x1] (!%p294_p10)  ;;  %vm505_vm10 = vcmask (!%p294_p10), 392192   ;;  %v502_v57 = vshrl.u32 (!%p294_p10), %v400_v9, 7  ;;  %s343_s21 = sand.u32 (!%p294_p10), 1, %s904_s26  }
  0x15   : > { %v404_v17 = vadd.s32 (!%p294_p10), 4294967295, %v401_v12  ;;  %s720_s22 = sshll.u32 (!%p294_p10), %s912_s28, 4  ;;  %s344_s23 = scalar_lea.vmem (!%p294_p10), [#allocation3], %s343_s21 }
  0x16   : > { %v503_v58 = vsub.s32 (!%p294_p10), 0, %v502_v57 }
  0x17   : > { %437 = vperm.xlu1 (!%p294_p10), %821, %v429_v4   ;;  %421 = vperm.xlu0 (!%p294_p10), %820, %v413_v5   ;;  %vm406_vm1 = vcmp.ge.s32.totalorder (!%p294_p10), %v404_v17, 0  ;;  %vm408_vm2 = vcmp.lt.s32.totalorder (!%p294_p10), %v404_v17, 19 }
  0x18   : > { %vm1050_vm3 = vmand (!%p294_p10), %vm406_vm1, %vm408_vm2 }
  0x19   : > { %s346_s19 = scalar_select %p345_p11, %s912_s28, 1  ;;  %vm750_vm6 = vmpackc.low %vm1050_vm3, %vm1050_vm3 }
  0x1a   : > { %s929_s28 = smov [#allocation3]  }
  0x1b   : > { %s723_s24 = sshll.u32 %s346_s19, 4  ;;  %s846_s15 = sshll.u32 %s929_s28, 4  ;;  %s847_s15 = int_to_ptr.vmem [resolvable:$false] %s846_s15 }
  0x1c   : > { %s352_s8 = scalar_lea.vmem %s1119_s0, %s723_s24  ;;  %s361_s16 = scalar_lea.vmem %s1120_s1, %s723_s24 }
  0x1d   : > { %v374_v6 = vld [vmem:[%s352_s8 + $0x8] sm:$0xff]  ;;  %v373_v7 = vld [vmem:[%s352_s8] sm:$0xff]  ;;  %s594_s24 = sshll.u32 %s344_s23, 4  ;;  %s1072_s8 = scalar_lea.hbm %s1126_s7, %s720_s22  ;;  %s1074_s24 = int_to_ptr.vmem [resolvable:$true] %s594_s24 }
  0x1e   : > { %381 = vrot.lane.b32.xlu1 %v374_v6, %s923_s10  ;;  %379 = vrot.lane.b32.xlu0 %v373_v7, %s923_s10  ;;  %v372_v15 = vld [vmem:[%s361_s16 + $0x8] sm:$0xff]  ;;  %v371_v16 = vld [vmem:[%s361_s16] sm:$0xff]  ;;  %s581_s10 = scalar_lea.sflag [#allocation4], %s343_s21  ;;  %s842_s12 = scalar_lea.vmem %s1074_s24, 16 }
  0x1f   : > { %p843_p12 = scmp.ne.s32.totalorder %s1074_s24, %s842_s12  ;;  %s848_s16 = scalar_lea.vmem %s847_s15, 32 }
  0x20   : > { %p849_p1 = scmp.lt.s32.totalorder %s1074_s24, %s847_s15  ;;  %p850_p2 = scmp.lt.s32.totalorder %s848_s16, %s842_s12 }
  0x21   : > { %p844_p13 = pnand %p843_p12, %p1013_p4 }
  0x22   : > { %p851_p3 = por %p850_p2, %p849_p1 }
  0x23   : > { %p845_p0 = pneg %p844_p13 }
  0x25   : > { %p852_p5 = pnand %p851_p3, %p845_p0 }
  0x92   : > { %v433_v10 = vpop.permute.xlu1 %432  ;;  %v417_v11 = vpop.permute.xlu0 %416 }
  0x96   : > { %v438_v13 = vpop.permute.xlu1 %437  ;;  %v422_v14 = vpop.permute.xlu0 %421 }
  0x9a   : > { %v382_v18 = vpop.permute.xlu1 %381  ;;  %v380_v19 = vpop.permute.xlu0 %379 }
  0x9b   : > { %v395_v20 = vsel %vm393_vm0, %v372_v15, %v382_v18  ;;  %v394_v21 = vsel %vm393_vm0, %v371_v16, %v380_v19 }
  0x9c   : > { %v426_v22 = vmul.f32 %v422_v14, %v395_v20  ;;  %v424_v23 = vmul.f32 %v417_v11, %v394_v21 }
  0x9e   : > { %v442_v24 = vadd.f32 %v438_v13, %v426_v22  ;;  %v440_v25 = vadd.f32 %v433_v10, %v424_v23 }
  0xa0   : > { %v450_v27 = vmul.f32 0.2, %v442_v24  ;;  %v448_v28 = vmul.f32 0.2, %v440_v25  ;;  %vm444_vm4 = vcmp.ge.f32.partialorder %v440_v25, 0.0  ;;  %vm446_vm5 = vcmp.ge.f32.partialorder %v442_v24, 0.0 }
  0xa2   : > { %v452_v29 = vsel %vm444_vm4, %v440_v25, %v448_v28  ;;  %v454_v30 = vsel %vm446_vm5, %v442_v24, %v450_v27 }
  0xa3   : > { %v749_v31 = vpack.c.bf16 %v454_v30, %v452_v29  ;;  %v462_v32 = vsel %vm1050_vm3, %v454_v30, 0.0  ;;  %v460_v33 = vsel %vm1050_vm3, %v452_v29, 0.0 }
  0xa4   : > { %v827_v35 = vpack.i.bf16 %v926_v34, %v462_v32  ;;  %v822_v36 = vpack.i.bf16 %v926_v34, %v460_v33 }
  0xa5   : > { %751 = vmatpush3.bf16.msk.msra.mxu0 %vm750_vm6, %v749_v31 }
  0xa6   : > { %828 = vrot.lane.b32.xlu1 %v827_v35, %s927_s17  ;;  %823 = vrot.lane.b32.xlu0 %v822_v36, %s927_s17 }
  0xa7   : > { %752 = vmatprep.subr.bf16.mxu0 %v924_v8 }
  0xaa   : > { %838 = vrot.lane.b32.xlu1 %v827_v35, %s928_s18  ;;  %833 = vrot.lane.b32.xlu0 %v822_v36, %s928_s18 }
  0xae   : > { %498 = vperm.xlu0 %820, %v495_v37  }
 0x118   : > { %v829_v38 = vpop.permute.xlu1 %828  ;;  %v824_v39 = vpop.permute.xlu0 %823 }
 0x119   : > { %v831_v40 = vunpack.i.h.bf16 %v829_v38  ;;  %v830_v41 = vunpack.i.l.bf16 %v829_v38  ;;  %v826_v42 = vunpack.i.h.bf16 %v824_v39  ;;  %v825_v43 = vunpack.i.l.bf16 %v824_v39 }
 0x11b   : > { %v477_v44 = vsel %vm476_vm8, %v825_v43, %v826_v42  ;;  %v478_v45 = vsel %vm476_vm8, %v830_v41, %v831_v40 }
 0x11c   : > { %v839_v46 = vpop.permute.xlu1 %838  ;;  %v834_v47 = vpop.permute.xlu0 %833  ;;  %v753_v48 = vpack.c.bf16 %v478_v45, %v477_v44 }
 0x11d   : > { %v841_v49 = vunpack.i.h.bf16 %v839_v46  ;;  %v840_v50 = vunpack.i.l.bf16 %v839_v46  ;;  %v836_v51 = vunpack.i.h.bf16 %v834_v47  ;;  %v835_v52 = vunpack.i.l.bf16 %v834_v47 }
 0x11e   : > { %754 = vmatpush3.bf16.msra.mxu0 %v753_v48 }
 0x11f   : > { %755 = vmatprep.subr.bf16.mxu0 %v924_v8  ;;  %v490_v53 = vsel %vm489_vm9, %v835_v52, %v836_v51  ;;  %v491_v54 = vsel %vm489_vm9, %v840_v50, %v841_v49 }
 0x120   : > { %v756_v55 = vpack.c.bf16 %v491_v54, %v490_v53 }
 0x122   : > { %757 = vmatpush3.bf16.msra.mxu0 %v756_v55 }
 0x125   : > { %746 = vmatmul.mubr.msk.f32.vlgmr.msra.gmra.mrb[0].mxu0 %vm505_vm10, %v494_v56 }
 0x12d   : > { %v499_v59 = vpop.permute.xlu0 %498 }
 0x12e   : > { %v504_v60 = vrot.slane %v499_v59, %v503_v58 }
 0x1f8   : > { %v575_v61 = vpop.f32.mrb[0].mxu0 }
 0x1f9   : > { %v576_v62 = vadd.f32 %v575_v61, %v504_v60  ;;  %v747_v63 = vpop.f32.mrb[1].mxu0 }
 0x1fb   : > { %579 = vst [vmem:[%s344_s23] sm:$0x1] %v576_v62 }
 0x1fc   : > { %855 = shalt.err (!%p852_p5)
}
 0x1fd   : > { %s856_s17 = scalar_lea.hbm %s1072_s8, 16  ;;  %s860_s20 = scalar_lea.hbm %s1126_s7, 32 }
 0x1fe   : > { %p857_p6 = scmp.ne.s32.totalorder %s1072_s8, %s856_s17  ;;  %p861_p10 = scmp.lt.u32.totalorder %s1072_s8, %s1126_s7 }
 0x1ff   : > { %p862_p11 = scmp.lt.u32.totalorder %s860_s20, %s856_s17  ;;  %p864_p13 = scmp.lt.u32.totalorder %s856_s17, %s1072_s8 }
 0x200   : > { %p858_p7 = pnand %p857_p6, %p1013_p4 }
 0x201   : > { %p863_p12 = por %p862_p11, %p861_p10 }
 0x202   : > { %p859_p9 = pneg %p858_p7 }
 0x203   : > { %p865_p0 = por %p864_p13, %p863_p12 }
 0x205   : > { %p866_p1 = pnand %p865_p0, %p859_p9 }
 0x207   : > { %869 = shalt.err (!%p866_p1)
}
 0x208   : > { %758 = dma.vmem_to_hbm [thread:$0]  (%p1013_p4), %s1074_s24, 16, %s1072_s8, %s581_s10  }
 0x209 PF: > { %p764_p2 = scmp.ge.s32.totalorder %s920_s30, 2  ;;  %s606_s23 = sand.u32 1, %s900_s2  }
 0x20a   : > { %s607_s25 = scalar_lea.sflag [#allocation4], %s606_s23 }
 0x20b   : > { %p761_p3 = pnand %p764_p2, %p1020_p8 }
 0x20d   : > { %895 = dma.done.wait (!%p761_p3), %s607_s25, 16  }
 0x20e   : > { %897 = vsyncadd (!%p761_p3), %s607_s25, 4294967280  ;;  %s22_s30 = sadd.s32 1, %s920_s30   ;;  %s1131_s2 = smov %s904_s26 }
 0x20f   : > { %p19_p5 = scmp.ge.s32.totalorder %s22_s30, 4   ;;  %s1132_s26 = smov %s908_s27 }
 0x210   : > { %s1133_s27 = smov %s1026_s14  ;;  %s1134_s28 = smov %s916_s29 }
 0x211   : > { %s1135_s29 = smov %s1137_s9  ;;  %21 = sbr.rel (!%p19_p5) target bundleno = 7 (0x7), region = 89 }
 0x218   :  { %611 = vsyncpa [#allocation4], 1 }
 0x219   :  { %613 = vsyncpa [#allocation4 + $0x1], 1 }

</bundles_post_ra>
